<compile_context>
chip_gen: v7x
topology: tpu7x:2x2x1
jax: 0.10.0
libtpu: 0.0.40
codegen_flags: <defaults>
</compile_context>

<pallas_src>
import jax
import jax.numpy as jnp
from jax.experimental import pallas as pl
from jax.experimental.pallas import tpu as pltpu


def _round_up(x, m):
    return (x + m - 1) // m * m


# ---------------------------------------------------------------------------
# Kernel 1: 3x3 conv (stride 1, pad 1) as nine shifted MXU matmuls over an
# in-VMEM halo slab (no HBM im2col) + per-tile partial BatchNorm statistics.
# ---------------------------------------------------------------------------
def conv_stats_kernel(x_ref, w_ref, conv_ref, stats_ref):
    # x_ref    : [1, H_pad+2, W+2, Cin_p]  padded NHWC image for batch n (VMEM,
    #                                      DMA'd once per n: constant block idx)
    # w_ref    : [9, Cin_p, Cp]            conv taps, index kh*3+kw
    # conv_ref : [TH*W, Cp]                pre-BN conv output tile (lane dense)
    # stats_ref: [1, 1, 8, Cp]             row 0 = sum, row 1 = sum of squares
    ht = pl.program_id(1)
    cin = x_ref.shape[3]
    w_img = x_ref.shape[2] - 2
    cp = conv_ref.shape[1]
    th = conv_ref.shape[0] // w_img

    # Halo slab for this row tile: [TH+2, W+2, Cin_p] (one dynamic load).
    slab = x_ref[0, pl.ds(ht * th, th + 2), :, :]

    acc = jnp.zeros((th * w_img, cp), jnp.float32)
    for kh in range(3):
        for kw in range(3):
            win = slab[kh:kh + th, kw:kw + w_img, :]       # [TH, W, Cin_p]
            win2d = win.reshape(th * w_img, cin)           # merge leading dims
            acc += jnp.dot(win2d, w_ref[kh * 3 + kw],
                           preferred_element_type=jnp.float32)

    conv_ref[...] = acc

    # Partial BN statistics (f32 accumulator).  Padded rows / channels are
    # exactly zero (zero input, no bias), so they contribute nothing.
    s = jnp.sum(acc, axis=0, keepdims=True)                # [1, Cp]
    ss = jnp.sum(acc * acc, axis=0, keepdims=True)         # [1, Cp]
    row = jax.lax.broadcasted_iota(jnp.int32, (8, cp), 0)
    st = jnp.where(row == 0, s, 0.0) + jnp.where(row == 1, ss, 0.0)
    stats_ref[...] = st.reshape(1, 1, 8, cp)


# ---------------------------------------------------------------------------
# Kernel 2: fused BatchNorm affine + PReLU (output aliased onto conv buffer).
# ---------------------------------------------------------------------------
def bn_prelu_kernel(a_ref, conv_ref, scale_ref, shift_ref, o_ref):
    # a_ref     : [1]      (SMEM) shared PReLU slope (nn.PReLU() default: 1 param)
    # conv_ref  : [TM, Cp]
    # scale_ref : [1, Cp]  gamma * rsqrt(var + eps)
    # shift_ref : [1, Cp]  beta  - mean * scale
    y = conv_ref[...] * scale_ref[...] + shift_ref[...]
    a = a_ref[0]
    o_ref[...] = jnp.where(y >= 0.0, y, a * y)


def conv_layer_forward(x_nchw, w_oihw, b, gamma, beta, prelu_a,
                       *, row_tile_elems=2048, eps=1e-5):
    """x_nchw: [N, Cin, H, W] float32 -> [N, Cout, H, W] float32."""
    N, Cin, H, W = x_nchw.shape
    Cout = w_oihw.shape[0]

    Cin_p = _round_up(Cin, 8)          # sublane-aligned contraction depth only
    Cp = _round_up(Cout, 128)          # lane-dense output channels
    TH = max(1, min(H, row_tile_elems // W))   # image rows per grid step
    HT = pl.cdiv(H, TH)
    H_pad = HT * TH
    M = N * H * W                      # true element count for BN mean/var
    Mp = N * H_pad * W
    TM = TH * W                        # output rows per grid step

    # ---- glue (plain JAX): layout conversion, halo/channel zero-pad, weights ----
    # TODO(synk): module interface is NCHW; keeping NHWC end-to-end (and fusing
    # the final transpose into the consumer) would remove two full HBM passes.
    x_nhwc = jnp.transpose(x_nchw, (0, 2, 3, 1)).astype(jnp.float32)
    x_pad = jnp.pad(
        x_nhwc,
        ((0, 0), (1, 1 + (H_pad - H)), (1, 1), (0, Cin_p - Cin)),
    )                                  # [N, H_pad+2, W+2, Cin_p]

    # [Cout, Cin, 3, 3] -> [3, 3, Cin, Cout] -> [9, Cin_p, Cp] (zero padded).
    w9 = jnp.transpose(w_oihw.astype(jnp.float32), (2, 3, 1, 0)).reshape(9, Cin, Cout)
    w9 = jnp.pad(w9, ((0, 0), (0, Cin_p - Cin), (0, Cp - Cout)))

    # Conv bias is an exact no-op ahead of training-mode BatchNorm (per-channel
    # mean subtraction removes it); drop it entirely.
    del b

    # TODO(synk): bf16 inputs / bf16 conv intermediate would halve HBM traffic
    # at ~1e-3 relative error; kept f32 to match PyTorch f32 forward numerics.

    cparams = pltpu.CompilerParams(
        dimension_semantics=("parallel", "parallel"),   # shard across TCs (v7x)
        vmem_limit_bytes=48 * 1024 * 1024,              # fits v7x's 64 MiB VMEM
    )

    # ---- pass 1: in-kernel im2col conv + per-tile partial statistics ----
    conv_out, stats = pl.pallas_call(
        conv_stats_kernel,
        out_shape=(
            jax.ShapeDtypeStruct((Mp, Cp), jnp.float32),
            jax.ShapeDtypeStruct((N, HT, 8, Cp), jnp.float32),
        ),
        grid=(N, HT),
        in_specs=[
            # Whole padded image per batch element; block index constant in ht,
            # so it is DMA'd once per n.
            pl.BlockSpec((1, H_pad + 2, W + 2, Cin_p), lambda n, h: (n, 0, 0, 0)),
            pl.BlockSpec((9, Cin_p, Cp), lambda n, h: (0, 0, 0)),
        ],
        out_specs=(
            pl.BlockSpec((TM, Cp), lambda n, h: (n * HT + h, 0)),
            pl.BlockSpec((1, 1, 8, Cp), lambda n, h: (n, h, 0, 0)),
        ),
        compiler_params=cparams,
    )(x_pad, w9)

    # ---- tiny cross-tile BN statistics reduction (plain JAX) ----
    # TODO(synk): E[x^2]-E[x]^2 in f32 can cancel for huge M / large magnitudes;
    # a Chan-style mean-centered combine would fix it at the same traffic.
    tot = stats.sum(axis=(0, 1))                       # [8, Cp]
    mean = tot[0] / M
    var = jnp.maximum(tot[1] / M - mean * mean, 0.0)
    inv = jax.lax.rsqrt(var + eps)
    gamma_p = jnp.pad(gamma.astype(jnp.float32), (0, Cp - Cout))
    beta_p = jnp.pad(beta.astype(jnp.float32), (0, Cp - Cout))
    scale = (gamma_p * inv).reshape(1, Cp)
    shift = (beta_p - mean * gamma_p * inv).reshape(1, Cp)
    a_arr = jnp.asarray(prelu_a, dtype=jnp.float32).reshape(1)

    # ---- pass 2: fused BatchNorm affine + PReLU (in place over conv_out) ----
    out = pl.pallas_call(
        bn_prelu_kernel,
        out_shape=jax.ShapeDtypeStruct((Mp, Cp), jnp.float32),
        grid=(N * HT,),
        in_specs=[
            pl.BlockSpec(memory_space=pltpu.MemorySpace.SMEM),   # PReLU slope
            pl.BlockSpec((TM, Cp), lambda i: (i, 0)),
            pl.BlockSpec((1, Cp), lambda i: (0, 0)),
            pl.BlockSpec((1, Cp), lambda i: (0, 0)),
        ],
        out_specs=pl.BlockSpec((TM, Cp), lambda i: (i, 0)),
        input_output_aliases={1: 0},                   # reuse conv_out buffer
        compiler_params=pltpu.CompilerParams(
            dimension_semantics=("parallel",),
            vmem_limit_bytes=48 * 1024 * 1024,
        ),
    )(a_arr, conv_out, scale, shift)

    # ---- glue back: un-pad, NHWC -> NCHW ----
    out = out.reshape(N, H_pad, W, Cp)[:, :H, :, :Cout]
    return jnp.transpose(out, (0, 3, 1, 2))

    # TODO(synk): BatchNorm running_mean/running_var updates are not produced
    # (forward output semantics only).


def _reference(x, w, b, gamma, beta, a):
    out = jax.lax.conv_general_dilated(
        x, w, window_strides=(1, 1), padding=((1, 1), (1, 1)),
        dimension_numbers=("NCHW", "OIHW", "NCHW"))
    out = out + b[None, :, None, None]
    mean = out.mean(axis=(0, 2, 3), keepdims=True)
    var = ((out - mean) ** 2).mean(axis=(0, 2, 3), keepdims=True)
    y = (out - mean) * jax.lax.rsqrt(var + 1e-5)
    y = y * gamma[None, :, None, None] + beta[None, :, None, None]
    return jnp.where(y >= 0, y, a * y)


if __name__ == "__main__":
    key = jax.random.PRNGKey(0)
    N, Cin, Cout, H, W = 2, 4, 8, 16, 16

    k_x, k_w, k_b = jax.random.split(key, 3)
    x = jax.random.normal(k_x, (N, Cin, H, W), dtype=jnp.float32)
    # Deterministic synthetic parameters (shapes from nn.Conv2d / BatchNorm2d / PReLU).
    w = jax.random.normal(k_w, (Cout, Cin, 3, 3), dtype=jnp.float32) * 0.1
    b = jax.random.normal(k_b, (Cout,), dtype=jnp.float32) * 0.1
    gamma = jnp.ones((Cout,), dtype=jnp.float32)      # BatchNorm weight init
    beta = jnp.zeros((Cout,), dtype=jnp.float32)      # BatchNorm bias init
    prelu_a = jnp.array(0.25, dtype=jnp.float32)      # PReLU default init

    fwd = jax.jit(conv_layer_forward)
    out = fwd(x, w, b, gamma, beta, prelu_a)
    out = jax.block_until_ready(out)

    ref = _reference(x, w, b, gamma, beta, prelu_a)
    assert out.shape == (N, Cout, H, W)
    assert jnp.allclose(out, ref, atol=1e-4, rtol=1e-4), "mismatch vs reference"

    print("KERNEL_OK")
</pallas_src>

<mosaic_0001>
module attributes {stable_mosaic.version = 11 : i64} {
  func.func @conv_stats_kernel(%arg0: i32, %arg1: i32, %arg2: memref<1x18x18x8xf32, #tpu.memory_space<vmem>>, %arg3: memref<9x8x128xf32, #tpu.memory_space<vmem>>, %arg4: memref<256x128xf32, #tpu.memory_space<vmem>>, %arg5: memref<1x1x8x128xf32, #tpu.memory_space<vmem>>) attributes {dimension_semantics = [#tpu.dimension_semantics<parallel>, #tpu.dimension_semantics<parallel>], iteration_bounds = array<i64: 2, 1>, scalar_prefetch = 0 : i64, scratch_operands = 0 : i64, tpu.core_type = #tpu.core_type<tc>, window_params = [{transform_indices = @transform_0, window_bounds = array<i64: 1, 18, 18, 8>}, {pipeline_mode = #tpu.pipeline_mode<synchronous>, transform_indices = @transform_1, window_bounds = array<i64: 9, 8, 128>}, {transform_indices = @transform_2, window_bounds = array<i64: 256, 128>}, {transform_indices = @transform_3, window_bounds = array<i64: 1, 1, 8, 128>}]} {
    %c16_i32 = arith.constant 16 : i32
    %0 = arith.muli %arg1, %c16_i32 : i32
    %c0 = arith.constant 0 : index
    %1 = arith.index_cast %0 : i32 to index
    %c0_0 = arith.constant 0 : index
    %c0_1 = arith.constant 0 : index
    %2 = vector.load %arg2[%c0, %1, %c0_0, %c0_1] : memref<1x18x18x8xf32, #tpu.memory_space<vmem>>, vector<1x18x18x8xf32>
    %3 = vector.shape_cast %2 : vector<1x18x18x8xf32> to vector<18x18x8xf32>
    %cst = arith.constant 0.000000e+00 : f32
    %4 = vector.broadcast %cst : f32 to vector<256x128xf32>
    %5 = vector.extract_strided_slice %3 {offsets = [0, 0, 0], sizes = [16, 16, 8], strides = [1, 1, 1]} : vector<18x18x8xf32> to vector<16x16x8xf32>
    %6 = vector.shape_cast %5 : vector<16x16x8xf32> to vector<256x8xf32>
    %c0_2 = arith.constant 0 : index
    %c0_3 = arith.constant 0 : index
    %c0_4 = arith.constant 0 : index
    %7 = vector.load %arg3[%c0_2, %c0_3, %c0_4] : memref<9x8x128xf32, #tpu.memory_space<vmem>>, vector<1x8x128xf32>
    %8 = vector.shape_cast %7 : vector<1x8x128xf32> to vector<8x128xf32>
    %cst_5 = arith.constant dense<0.000000e+00> : vector<256x128xf32>
    %9 = tpu.matmul %6, %8, %cst_5 {dimension_numbers = #tpu.dot_dimension_numbers<[1], [0], [0], [1], [0, 0, 1, 1], [], []>} : vector<256x8xf32>, vector<8x128xf32>, vector<256x128xf32> -> vector<256x128xf32>
    %10 = arith.addf %4, %9 : vector<256x128xf32>
    %11 = vector.extract_strided_slice %3 {offsets = [0, 1, 0], sizes = [16, 16, 8], strides = [1, 1, 1]} : vector<18x18x8xf32> to vector<16x16x8xf32>
    %12 = vector.shape_cast %11 : vector<16x16x8xf32> to vector<256x8xf32>
    %c1 = arith.constant 1 : index
    %c0_6 = arith.constant 0 : index
    %c0_7 = arith.constant 0 : index
    %13 = vector.load %arg3[%c1, %c0_6, %c0_7] : memref<9x8x128xf32, #tpu.memory_space<vmem>>, vector<1x8x128xf32>
    %14 = vector.shape_cast %13 : vector<1x8x128xf32> to vector<8x128xf32>
    %cst_8 = arith.constant dense<0.000000e+00> : vector<256x128xf32>
    %15 = tpu.matmul %12, %14, %cst_8 {dimension_numbers = #tpu.dot_dimension_numbers<[1], [0], [0], [1], [0, 0, 1, 1], [], []>} : vector<256x8xf32>, vector<8x128xf32>, vector<256x128xf32> -> vector<256x128xf32>
    %16 = arith.addf %10, %15 : vector<256x128xf32>
    %17 = vector.extract_strided_slice %3 {offsets = [0, 2, 0], sizes = [16, 16, 8], strides = [1, 1, 1]} : vector<18x18x8xf32> to vector<16x16x8xf32>
    %18 = vector.shape_cast %17 : vector<16x16x8xf32> to vector<256x8xf32>
    %c2 = arith.constant 2 : index
    %c0_9 = arith.constant 0 : index
    %c0_10 = arith.constant 0 : index
    %19 = vector.load %arg3[%c2, %c0_9, %c0_10] : memref<9x8x128xf32, #tpu.memory_space<vmem>>, vector<1x8x128xf32>
    %20 = vector.shape_cast %19 : vector<1x8x128xf32> to vector<8x128xf32>
    %cst_11 = arith.constant dense<0.000000e+00> : vector<256x128xf32>
    %21 = tpu.matmul %18, %20, %cst_11 {dimension_numbers = #tpu.dot_dimension_numbers<[1], [0], [0], [1], [0, 0, 1, 1], [], []>} : vector<256x8xf32>, vector<8x128xf32>, vector<256x128xf32> -> vector<256x128xf32>
    %22 = arith.addf %16, %21 : vector<256x128xf32>
    %23 = vector.extract_strided_slice %3 {offsets = [1, 0, 0], sizes = [16, 16, 8], strides = [1, 1, 1]} : vector<18x18x8xf32> to vector<16x16x8xf32>
    %24 = vector.shape_cast %23 : vector<16x16x8xf32> to vector<256x8xf32>
    %c3 = arith.constant 3 : index
    %c0_12 = arith.constant 0 : index
    %c0_13 = arith.constant 0 : index
    %25 = vector.load %arg3[%c3, %c0_12, %c0_13] : memref<9x8x128xf32, #tpu.memory_space<vmem>>, vector<1x8x128xf32>
    %26 = vector.shape_cast %25 : vector<1x8x128xf32> to vector<8x128xf32>
    %cst_14 = arith.constant dense<0.000000e+00> : vector<256x128xf32>
    %27 = tpu.matmul %24, %26, %cst_14 {dimension_numbers = #tpu.dot_dimension_numbers<[1], [0], [0], [1], [0, 0, 1, 1], [], []>} : vector<256x8xf32>, vector<8x128xf32>, vector<256x128xf32> -> vector<256x128xf32>
    %28 = arith.addf %22, %27 : vector<256x128xf32>
    %29 = vector.extract_strided_slice %3 {offsets = [1, 1, 0], sizes = [16, 16, 8], strides = [1, 1, 1]} : vector<18x18x8xf32> to vector<16x16x8xf32>
    %30 = vector.shape_cast %29 : vector<16x16x8xf32> to vector<256x8xf32>
    %c4 = arith.constant 4 : index
    %c0_15 = arith.constant 0 : index
    %c0_16 = arith.constant 0 : index
    %31 = vector.load %arg3[%c4, %c0_15, %c0_16] : memref<9x8x128xf32, #tpu.memory_space<vmem>>, vector<1x8x128xf32>
    %32 = vector.shape_cast %31 : vector<1x8x128xf32> to vector<8x128xf32>
    %cst_17 = arith.constant dense<0.000000e+00> : vector<256x128xf32>
    %33 = tpu.matmul %30, %32, %cst_17 {dimension_numbers = #tpu.dot_dimension_numbers<[1], [0], [0], [1], [0, 0, 1, 1], [], []>} : vector<256x8xf32>, vector<8x128xf32>, vector<256x128xf32> -> vector<256x128xf32>
    %34 = arith.addf %28, %33 : vector<256x128xf32>
    %35 = vector.extract_strided_slice %3 {offsets = [1, 2, 0], sizes = [16, 16, 8], strides = [1, 1, 1]} : vector<18x18x8xf32> to vector<16x16x8xf32>
    %36 = vector.shape_cast %35 : vector<16x16x8xf32> to vector<256x8xf32>
    %c5 = arith.constant 5 : index
    %c0_18 = arith.constant 0 : index
    %c0_19 = arith.constant 0 : index
    %37 = vector.load %arg3[%c5, %c0_18, %c0_19] : memref<9x8x128xf32, #tpu.memory_space<vmem>>, vector<1x8x128xf32>
    %38 = vector.shape_cast %37 : vector<1x8x128xf32> to vector<8x128xf32>
    %cst_20 = arith.constant dense<0.000000e+00> : vector<256x128xf32>
    %39 = tpu.matmul %36, %38, %cst_20 {dimension_numbers = #tpu.dot_dimension_numbers<[1], [0], [0], [1], [0, 0, 1, 1], [], []>} : vector<256x8xf32>, vector<8x128xf32>, vector<256x128xf32> -> vector<256x128xf32>
    %40 = arith.addf %34, %39 : vector<256x128xf32>
    %41 = vector.extract_strided_slice %3 {offsets = [2, 0, 0], sizes = [16, 16, 8], strides = [1, 1, 1]} : vector<18x18x8xf32> to vector<16x16x8xf32>
    %42 = vector.shape_cast %41 : vector<16x16x8xf32> to vector<256x8xf32>
    %c6 = arith.constant 6 : index
    %c0_21 = arith.constant 0 : index
    %c0_22 = arith.constant 0 : index
    %43 = vector.load %arg3[%c6, %c0_21, %c0_22] : memref<9x8x128xf32, #tpu.memory_space<vmem>>, vector<1x8x128xf32>
    %44 = vector.shape_cast %43 : vector<1x8x128xf32> to vector<8x128xf32>
    %cst_23 = arith.constant dense<0.000000e+00> : vector<256x128xf32>
    %45 = tpu.matmul %42, %44, %cst_23 {dimension_numbers = #tpu.dot_dimension_numbers<[1], [0], [0], [1], [0, 0, 1, 1], [], []>} : vector<256x8xf32>, vector<8x128xf32>, vector<256x128xf32> -> vector<256x128xf32>
    %46 = arith.addf %40, %45 : vector<256x128xf32>
    %47 = vector.extract_strided_slice %3 {offsets = [2, 1, 0], sizes = [16, 16, 8], strides = [1, 1, 1]} : vector<18x18x8xf32> to vector<16x16x8xf32>
    %48 = vector.shape_cast %47 : vector<16x16x8xf32> to vector<256x8xf32>
    %c7 = arith.constant 7 : index
    %c0_24 = arith.constant 0 : index
    %c0_25 = arith.constant 0 : index
    %49 = vector.load %arg3[%c7, %c0_24, %c0_25] : memref<9x8x128xf32, #tpu.memory_space<vmem>>, vector<1x8x128xf32>
    %50 = vector.shape_cast %49 : vector<1x8x128xf32> to vector<8x128xf32>
    %cst_26 = arith.constant dense<0.000000e+00> : vector<256x128xf32>
    %51 = tpu.matmul %48, %50, %cst_26 {dimension_numbers = #tpu.dot_dimension_numbers<[1], [0], [0], [1], [0, 0, 1, 1], [], []>} : vector<256x8xf32>, vector<8x128xf32>, vector<256x128xf32> -> vector<256x128xf32>
    %52 = arith.addf %46, %51 : vector<256x128xf32>
    %53 = vector.extract_strided_slice %3 {offsets = [2, 2, 0], sizes = [16, 16, 8], strides = [1, 1, 1]} : vector<18x18x8xf32> to vector<16x16x8xf32>
    %54 = vector.shape_cast %53 : vector<16x16x8xf32> to vector<256x8xf32>
    %c8 = arith.constant 8 : index
    %c0_27 = arith.constant 0 : index
    %c0_28 = arith.constant 0 : index
    %55 = vector.load %arg3[%c8, %c0_27, %c0_28] : memref<9x8x128xf32, #tpu.memory_space<vmem>>, vector<1x8x128xf32>
    %56 = vector.shape_cast %55 : vector<1x8x128xf32> to vector<8x128xf32>
    %cst_29 = arith.constant dense<0.000000e+00> : vector<256x128xf32>
    %57 = tpu.matmul %54, %56, %cst_29 {dimension_numbers = #tpu.dot_dimension_numbers<[1], [0], [0], [1], [0, 0, 1, 1], [], []>} : vector<256x8xf32>, vector<8x128xf32>, vector<256x128xf32> -> vector<256x128xf32>
    %58 = arith.addf %52, %57 : vector<256x128xf32>
    %c0_30 = arith.constant 0 : index
    %c0_31 = arith.constant 0 : index
    %59 = vector.load %arg4[%c0_30, %c0_31] : memref<256x128xf32, #tpu.memory_space<vmem>>, vector<256x128xf32>
    tpu.vector_store %arg4[%c0_30, %c0_31], %58 {strides = array<i32>} : memref<256x128xf32, #tpu.memory_space<vmem>>, vector<256x128xf32>,
    %cst_32 = arith.constant dense<0.000000e+00> : vector<128xf32>
    %60 = vector.multi_reduction <add>, %58, %cst_32 [0] : vector<256x128xf32> to vector<128xf32>
    %61 = vector.shape_cast %60 : vector<128xf32> to vector<1x128xf32>
    %62 = arith.mulf %58, %58 : vector<256x128xf32>
    %cst_33 = arith.constant dense<0.000000e+00> : vector<128xf32>
    %63 = vector.multi_reduction <add>, %62, %cst_33 [0] : vector<256x128xf32> to vector<128xf32>
    %64 = vector.shape_cast %63 : vector<128xf32> to vector<1x128xf32>
    %65 = tpu.iota {dimensions = array<i32: 0>} : vector<8x128xi32>
    %c0_i32 = arith.constant 0 : i32
    %66 = vector.broadcast %c0_i32 : i32 to vector<8x128xi32>
    %67 = arith.cmpi eq, %65, %66 : vector<8x128xi32>
    %cst_34 = arith.constant 0.000000e+00 : f32
    %68 = vector.shape_cast %61 : vector<1x128xf32> to vector<1x128xf32>
    %69 = vector.broadcast %68 : vector<1x128xf32> to vector<8x128xf32>
    %70 = vector.broadcast %cst_34 : f32 to vector<8x128xf32>
    %71 = arith.select %67, %69, %70 : vector<8x128xi1>, vector<8x128xf32>
    %c1_i32 = arith.constant 1 : i32
    %72 = vector.broadcast %c1_i32 : i32 to vector<8x128xi32>
    %73 = arith.cmpi eq, %65, %72 : vector<8x128xi32>
    %cst_35 = arith.constant 0.000000e+00 : f32
    %74 = vector.shape_cast %64 : vector<1x128xf32> to vector<1x128xf32>
    %75 = vector.broadcast %74 : vector<1x128xf32> to vector<8x128xf32>
    %76 = vector.broadcast %cst_35 : f32 to vector<8x128xf32>
    %77 = arith.select %73, %75, %76 : vector<8x128xi1>, vector<8x128xf32>
    %78 = arith.addf %71, %77 : vector<8x128xf32>
    %79 = vector.shape_cast %78 : vector<8x128xf32> to vector<1x1x8x128xf32>
    %c0_36 = arith.constant 0 : index
    %c0_37 = arith.constant 0 : index
    %c0_38 = arith.constant 0 : index
    %c0_39 = arith.constant 0 : index
    %80 = vector.load %arg5[%c0_36, %c0_37, %c0_38, %c0_39] : memref<1x1x8x128xf32, #tpu.memory_space<vmem>>, vector<1x1x8x128xf32>
    tpu.vector_store %arg5[%c0_36, %c0_37, %c0_38, %c0_39], %79 {strides = array<i32>} : memref<1x1x8x128xf32, #tpu.memory_space<vmem>>, vector<1x1x8x128xf32>,
    return
  }
  func.func @transform_0(%arg0: i32, %arg1: i32) -> (i32, i32, i32, i32) {
    %c0_i32 = arith.constant 0 : i32
    %c0_i32_0 = arith.constant 0 : i32
    %c0_i32_1 = arith.constant 0 : i32
    %c0_i32_2 = arith.constant 0 : i32
    return %arg0, %c0_i32, %c0_i32_0, %c0_i32_1 : i32, i32, i32, i32
  }
  func.func @transform_1(%arg0: i32, %arg1: i32) -> (i32, i32, i32) {
    %c0_i32 = arith.constant 0 : i32
    %c0_i32_0 = arith.constant 0 : i32
    %c0_i32_1 = arith.constant 0 : i32
    %c0_i32_2 = arith.constant 0 : i32
    return %c0_i32, %c0_i32_0, %c0_i32_1 : i32, i32, i32
  }
  func.func @transform_2(%arg0: i32, %arg1: i32) -> (i32, i32) {
    %c1_i32 = arith.constant 1 : i32
    %0 = arith.muli %arg0, %c1_i32 : i32
    %1 = arith.addi %0, %arg1 : i32
    %c0_i32 = arith.constant 0 : i32
    %c0_i32_0 = arith.constant 0 : i32
    return %1, %c0_i32 : i32, i32
  }
  func.func @transform_3(%arg0: i32, %arg1: i32) -> (i32, i32, i32, i32) {
    %c0_i32 = arith.constant 0 : i32
    %c0_i32_0 = arith.constant 0 : i32
    %c0_i32_1 = arith.constant 0 : i32
    return %arg0, %arg1, %c0_i32, %c0_i32_0 : i32, i32, i32, i32
  }
}

module attributes {stable_mosaic.version = 11 : i64} {
  func.func @bn_prelu_kernel(%arg0: i32, %arg1: memref<1xf32, #tpu.memory_space<smem>>, %arg2: memref<256x128xf32, #tpu.memory_space<vmem>>, %arg3: memref<1x128xf32, #tpu.memory_space<vmem>>, %arg4: memref<1x128xf32, #tpu.memory_space<vmem>>, %arg5: memref<256x128xf32, #tpu.memory_space<vmem>>) attributes {dimension_semantics = [#tpu.dimension_semantics<parallel>], iteration_bounds = array<i64: 2>, scalar_prefetch = 0 : i64, scratch_operands = 0 : i64, tpu.core_type = #tpu.core_type<tc>, window_params = [{transform_indices = @transform_0, window_bounds = array<i64: 1>}, {transform_indices = @transform_1, window_bounds = array<i64: 256, 128>}, {pipeline_mode = #tpu.pipeline_mode<synchronous>, transform_indices = @transform_2, window_bounds = array<i64: 1, 128>}, {pipeline_mode = #tpu.pipeline_mode<synchronous>, transform_indices = @transform_3, window_bounds = array<i64: 1, 128>}, {transform_indices = @transform_4, window_bounds = array<i64: 256, 128>}]} {
    %c0 = arith.constant 0 : index
    %c0_0 = arith.constant 0 : index
    %0 = vector.load %arg2[%c0, %c0_0] : memref<256x128xf32, #tpu.memory_space<vmem>>, vector<256x128xf32>
    %c0_1 = arith.constant 0 : index
    %c0_2 = arith.constant 0 : index
    %1 = vector.load %arg3[%c0_1, %c0_2] : memref<1x128xf32, #tpu.memory_space<vmem>>, vector<1x128xf32>
    %2 = vector.broadcast %1 : vector<1x128xf32> to vector<256x128xf32>
    %3 = arith.mulf %0, %2 : vector<256x128xf32>
    %c0_3 = arith.constant 0 : index
    %c0_4 = arith.constant 0 : index
    %4 = vector.load %arg4[%c0_3, %c0_4] : memref<1x128xf32, #tpu.memory_space<vmem>>, vector<1x128xf32>
    %5 = vector.broadcast %4 : vector<1x128xf32> to vector<256x128xf32>
    %6 = arith.addf %3, %5 : vector<256x128xf32>
    %c0_5 = arith.constant 0 : index
    %7 = memref.load %arg1[%c0_5] : memref<1xf32, #tpu.memory_space<smem>>
    %cst = arith.constant 0.000000e+00 : f32
    %8 = vector.broadcast %cst : f32 to vector<256x128xf32>
    %9 = arith.cmpf oge, %6, %8 : vector<256x128xf32>
    %10 = vector.broadcast %7 : f32 to vector<256x128xf32>
    %11 = arith.mulf %10, %6 : vector<256x128xf32>
    %12 = arith.select %9, %6, %11 : vector<256x128xi1>, vector<256x128xf32>
    %c0_6 = arith.constant 0 : index
    %c0_7 = arith.constant 0 : index
    %13 = vector.load %arg5[%c0_6, %c0_7] : memref<256x128xf32, #tpu.memory_space<vmem>>, vector<256x128xf32>
    tpu.vector_store %arg5[%c0_6, %c0_7], %12 {strides = array<i32>} : memref<256x128xf32, #tpu.memory_space<vmem>>, vector<256x128xf32>,
    return
  }
  func.func @transform_0(%arg0: i32) -> i32 {
    %c0_i32 = arith.constant 0 : i32
    %c0_i32_0 = arith.constant 0 : i32
    return %c0_i32 : i32
  }
  func.func @transform_1(%arg0: i32) -> (i32, i32) {
    %c0_i32 = arith.constant 0 : i32
    %c0_i32_0 = arith.constant 0 : i32
    return %arg0, %c0_i32 : i32, i32
  }
  func.func @transform_2(%arg0: i32) -> (i32, i32) {
    %c0_i32 = arith.constant 0 : i32
    %c0_i32_0 = arith.constant 0 : i32
    %c0_i32_1 = arith.constant 0 : i32
    return %c0_i32, %c0_i32_0 : i32, i32
  }
  func.func @transform_3(%arg0: i32) -> (i32, i32) {
    %c0_i32 = arith.constant 0 : i32
    %c0_i32_0 = arith.constant 0 : i32
    %c0_i32_1 = arith.constant 0 : i32
    return %c0_i32, %c0_i32_0 : i32, i32
  }
  func.func @transform_4(%arg0: i32) -> (i32, i32) {
    %c0_i32 = arith.constant 0 : i32
    %c0_i32_0 = arith.constant 0 : i32
    return %arg0, %c0_i32 : i32, i32
  }
}

</mosaic_0001>

<bundles_post_ra>
// kernel: conv_layer_forward.3
= control target key start
LH: loop header
LB: loop body
LE: loop exit
PB: predicated region body
PF: predicated region fallthrough
CT: control target
= control target key end

     0   :  { %s555_s17 = smov 0   ;;  %s812_s0 = inlined_call_operand.<no memory space> [shape: f32[1], index: 0, kind: input, shape index: {}]   ;;  %s813_s1 = inlined_call_operand.vmem [shape: f32[512,128], index: 1, kind: input, shape index: {}, may-alias: {1,4}]   ;;  %s814_s2 = inlined_call_operand.vmem [shape: f32[1,128], index: 2, kind: input, shape index: {}]   ;;  %s815_s3 = inlined_call_operand.vmem [shape: f32[1,128], index: 3, kind: input, shape index: {}]   ;;  %s816_s4 = inlined_call_operand.vmem [shape: f32[512,128], index: 4, kind: output, shape index: {}, may-alias: {1,4}]  }
   0x1   :  { %9 = sst [smem:[#allocation2]] %s812_s0 }
   0x2 LB: > { %s498_s18 = sadd.s32 4294967295, %s525_s17   ;;  %p502_p0 = scmp.ge.s32.totalorder %s525_s17, 1  ;;  %s525_s17 = sphi %s555_s17, %s15_s17  }
   0x3   : > { %p164_p1 = scmp.lt.s32.totalorder %s525_s17, 3 }
   0x5   : > { %p165_p2 = pnand %p502_p0, %p164_p1 }
   0x6   : > { %s503_s19 = sshll.u32 (!%p165_p2), %s498_s18, 5  ;;  %s312_s20 = sld [smem:[#allocation2]] (!%p165_p2)  ;;  %v569_v0 = vld [vmem:[%s814_s2] ss:$0 sm:$0xff] (!%p165_p2) }
   0x7   : > { %168 = sbr.rel (%p165_p2) target bundleno = 63 (0x3f), region = 36  ;;  %p191_p3 = scmp.lt.s32.totalorder (!%p165_p2), %s503_s19, 63  ;;  %v581_v1 = vld [vmem:[%s815_s3] ss:$0 sm:$0xff] (!%p165_p2) }
   0xc   : > { %v594_v13 = vstv (!%p165_p2), %s312_s20 }
   0xe   : > { %s818_s19 = smov (!%p191_p3, %s503_s19), 63 }
   0xf   : > { %s504_s0 = sshll.u32 %s818_s19, 3 }
  0x10   : > { %s576_s25 = scalar_lea.vmem %s813_s1, %s504_s0  ;;  %s621_s30 = scalar_lea.vmem %s816_s4, %s504_s0 }
  0x11   : > { %v202_v2 = vld [vmem:[%s576_s25] sm:$0xff]  ;;  %v203_v3 = vld [vmem:[%s576_s25 + $0x8] sm:$0xff]  ;;  %v204_v4 = vld [vmem:[%s576_s25 + $0x10] sm:$0xff] }
  0x12   : > { %v205_v5 = vld [vmem:[%s576_s25 + $0x18] sm:$0xff]  ;;  %v206_v6 = vld [vmem:[%s576_s25 + $0x20] sm:$0xff]  ;;  %v207_v7 = vld [vmem:[%s576_s25 + $0x28] sm:$0xff]  ;;  %v241_v8 = vmul.f32 %v569_v0, %v202_v2  ;;  %v242_v9 = vmul.f32 %v569_v0, %v203_v3  ;;  %v243_v10 = vmul.f32 %v569_v0, %v204_v4 }
  0x13   : > { %v208_v11 = vld [vmem:[%s576_s25 + $0x30] sm:$0xff]  ;;  %v209_v12 = vld [vmem:[%s576_s25 + $0x38] sm:$0xff]  ;;  %v244_v14 = vmul.f32 %v569_v0, %v205_v5  ;;  %v245_v15 = vmul.f32 %v569_v0, %v206_v6  ;;  %v246_v16 = vmul.f32 %v569_v0, %v207_v7  ;;  %v210_v27 = vld [vmem:[%s576_s25 + $0x40] sm:$0xff] }
  0x14   : > { %v280_v17 = vadd.f32 %v581_v1, %v241_v8  ;;  %v281_v18 = vadd.f32 %v581_v1, %v242_v9  ;;  %v282_v19 = vadd.f32 %v581_v1, %v243_v10  ;;  %v247_v20 = vmul.f32 %v569_v0, %v208_v11  ;;  %v211_v30 = vld [vmem:[%s576_s25 + $0x48] sm:$0xff]  ;;  %v212_v31 = vld [vmem:[%s576_s25 + $0x50] sm:$0xff]  ;;  %v213_v32 = vld [vmem:[%s576_s25 + $0x58] sm:$0xff] }
  0x15   : > { %v283_v21 = vadd.f32 %v581_v1, %v244_v14  ;;  %v284_v22 = vadd.f32 %v581_v1, %v245_v15  ;;  %v285_v23 = vadd.f32 %v581_v1, %v246_v16  ;;  %v248_v24 = vmul.f32 %v569_v0, %v209_v12  ;;  %v214_v36 = vld [vmem:[%s576_s25 + $0x60] sm:$0xff]  ;;  %v215_v37 = vld [vmem:[%s576_s25 + $0x68] sm:$0xff]  ;;  %v626_v38 = vld [vmem:[%s576_s25 + $0x70] sm:$0xff] }
  0x16   : > { %vm313_vm0 = vcmp.ge.f32.partialorder %v280_v17, 0.0  ;;  %v346_v25 = vmul.f32 %v594_v13, %v280_v17  ;;  %vm314_vm1 = vcmp.ge.f32.partialorder %v281_v18, 0.0  ;;  %v347_v26 = vmul.f32 %v594_v13, %v281_v18  ;;  %v629_v39 = vld [vmem:[%s576_s25 + $0x78] sm:$0xff]  ;;  %v632_v40 = vld [vmem:[%s576_s25 + $0x80] sm:$0xff]  ;;  %v635_v41 = vld [vmem:[%s576_s25 + $0x88] sm:$0xff] }
  0x17   : > { %vm315_vm2 = vcmp.ge.f32.partialorder %v282_v19, 0.0  ;;  %v348_v28 = vmul.f32 %v594_v13, %v282_v19  ;;  %vm316_vm3 = vcmp.ge.f32.partialorder %v283_v21, 0.0  ;;  %v349_v29 = vmul.f32 %v594_v13, %v283_v21  ;;  %v638_v42 = vld [vmem:[%s576_s25 + $0x90] sm:$0xff]  ;;  %v641_v43 = vld [vmem:[%s576_s25 + $0x98] sm:$0xff]  ;;  %v644_v44 = vld [vmem:[%s576_s25 + $0xa0] sm:$0xff] }
  0x18   : > { %v378_v33 = vsel %vm313_vm0, %v280_v17, %v346_v25  ;;  %v379_v34 = vsel %vm314_vm1, %v281_v18, %v347_v26  ;;  %vm317_vm4 = vcmp.ge.f32.partialorder %v284_v22, 0.0  ;;  %v350_v35 = vmul.f32 %v594_v13, %v284_v22  ;;  %v647_v45 = vld [vmem:[%s576_s25 + $0xa8] sm:$0xff]  ;;  %v650_v46 = vld [vmem:[%s576_s25 + $0xb0] sm:$0xff]  ;;  %v653_v47 = vld [vmem:[%s576_s25 + $0xb8] sm:$0xff] }
  0x19   : > { %v656_v48 = vld [vmem:[%s576_s25 + $0xc0] sm:$0xff]  ;;  %v659_v49 = vld [vmem:[%s576_s25 + $0xc8] sm:$0xff]  ;;  %v380_v50 = vsel %vm315_vm2, %v282_v19, %v348_v28  ;;  %v381_v51 = vsel %vm316_vm3, %v283_v21, %v349_v29  ;;  %vm318_vm5 = vcmp.ge.f32.partialorder %v285_v23, 0.0  ;;  %v351_v52 = vmul.f32 %v594_v13, %v285_v23  ;;  %v665_v53 = vld [vmem:[%s576_s25 + $0xd0] sm:$0xff] }
  0x1a   : > { %v668_v54 = vld [vmem:[%s576_s25 + $0xd8] sm:$0xff]  ;;  %v671_v55 = vld [vmem:[%s576_s25 + $0xe0] sm:$0xff]  ;;  %v382_v56 = vsel %vm317_vm4, %v284_v22, %v350_v35  ;;  %v286_v57 = vadd.f32 %v581_v1, %v247_v20  ;;  %v287_v58 = vadd.f32 %v581_v1, %v248_v24  ;;  %v249_v59 = vmul.f32 %v569_v0, %v210_v27  ;;  %v678_v60 = vld [vmem:[%s576_s25 + $0xe8] sm:$0xff] }
  0x1b   : > { %v681_v61 = vld [vmem:[%s576_s25 + $0xf0] sm:$0xff]  ;;  %v684_v62 = vld [vmem:[%s576_s25 + $0xf8] sm:$0xff]  ;;  %v383_v63 = vsel %vm318_vm5, %v285_v23, %v351_v52  ;;  %v250_v2 = vmul.f32 %v569_v0, %v211_v30  ;;  %v251_v3 = vmul.f32 %v569_v0, %v212_v31  ;;  %v252_v4 = vmul.f32 %v569_v0, %v213_v32 }
  0x1c   : > { %410 = vst [vmem:[%s621_s30] sm:$0xff] %v378_v33  ;;  %411 = vst [vmem:[%s621_s30 + $0x8] sm:$0xff] %v379_v34  ;;  %vm319_vm6 = vcmp.ge.f32.partialorder %v286_v57, 0.0  ;;  %v352_v5 = vmul.f32 %v594_v13, %v286_v57  ;;  %vm320_vm7 = vcmp.ge.f32.partialorder %v287_v58, 0.0  ;;  %v353_v6 = vmul.f32 %v594_v13, %v287_v58 }
  0x1d   : > { %412 = vst [vmem:[%s621_s30 + $0x10] sm:$0xff] %v380_v50  ;;  %413 = vst [vmem:[%s621_s30 + $0x18] sm:$0xff] %v381_v51  ;;  %v288_v7 = vadd.f32 %v581_v1, %v249_v59  ;;  %v289_v8 = vadd.f32 %v581_v1, %v250_v2  ;;  %v290_v9 = vadd.f32 %v581_v1, %v251_v3 }
  0x1e   : > { %414 = vst [vmem:[%s621_s30 + $0x20] sm:$0xff] %v382_v56  ;;  %415 = vst [vmem:[%s621_s30 + $0x28] sm:$0xff] %v383_v63  ;;  %v291_v10 = vadd.f32 %v581_v1, %v252_v4  ;;  %v384_v11 = vsel %vm319_vm6, %v286_v57, %v352_v5  ;;  %v385_v12 = vsel %vm320_vm7, %v287_v58, %v353_v6 }
  0x1f   : > { %v253_v14 = vmul.f32 %v569_v0, %v214_v36  ;;  %v254_v15 = vmul.f32 %v569_v0, %v215_v37  ;;  %416 = vst [vmem:[%s621_s30 + $0x30] sm:$0xff] %v384_v11  ;;  %417 = vst [vmem:[%s621_s30 + $0x38] sm:$0xff] %v385_v12  ;;  %vm321_vm8 = vcmp.ge.f32.partialorder %v288_v7, 0.0  ;;  %v354_v16 = vmul.f32 %v594_v13, %v288_v7 }
  0x20   : > { %vm322_vm9 = vcmp.ge.f32.partialorder %v289_v8, 0.0  ;;  %v355_v17 = vmul.f32 %v594_v13, %v289_v8  ;;  %vm323_vm10 = vcmp.ge.f32.partialorder %v290_v9, 0.0  ;;  %v356_v18 = vmul.f32 %v594_v13, %v290_v9 }
  0x21   : > { %vm324_vm11 = vcmp.ge.f32.partialorder %v291_v10, 0.0  ;;  %v357_v19 = vmul.f32 %v594_v13, %v291_v10  ;;  %v386_v20 = vsel %vm321_vm8, %v288_v7, %v354_v16  ;;  %v292_v22 = vadd.f32 %v581_v1, %v253_v14 }
  0x22   : > { %v387_v21 = vsel %vm322_vm9, %v289_v8, %v355_v17  ;;  %v293_v23 = vadd.f32 %v581_v1, %v254_v15  ;;  %418 = vst [vmem:[%s621_s30 + $0x40] sm:$0xff] %v386_v20  ;;  %v388_v24 = vsel %vm323_vm10, %v290_v9, %v356_v18  ;;  %v255_v26 = vmul.f32 %v569_v0, %v626_v38 }
  0x23   : > { %419 = vst [vmem:[%s621_s30 + $0x48] sm:$0xff] %v387_v21  ;;  %v389_v25 = vsel %vm324_vm11, %v291_v10, %v357_v19  ;;  %v256_v27 = vmul.f32 %v569_v0, %v629_v39  ;;  %420 = vst [vmem:[%s621_s30 + $0x50] sm:$0xff] %v388_v24  ;;  %vm325_vm12 = vcmp.ge.f32.partialorder %v292_v22, 0.0  ;;  %v358_v28 = vmul.f32 %v594_v13, %v292_v22 }
  0x24   : > { %421 = vst [vmem:[%s621_s30 + $0x58] sm:$0xff] %v389_v25  ;;  %vm326_vm13 = vcmp.ge.f32.partialorder %v293_v23, 0.0  ;;  %v359_v29 = vmul.f32 %v594_v13, %v293_v23  ;;  %v294_v30 = vadd.f32 %v581_v1, %v255_v26  ;;  %v257_v32 = vmul.f32 %v569_v0, %v632_v40 }
  0x25   : > { %v295_v31 = vadd.f32 %v581_v1, %v256_v27  ;;  %v258_v33 = vmul.f32 %v569_v0, %v635_v41  ;;  %v390_v34 = vsel %vm325_vm12, %v292_v22, %v358_v28  ;;  %v259_v36 = vmul.f32 %v569_v0, %v638_v42 }
  0x26   : > { %v391_v35 = vsel %vm326_vm13, %v293_v23, %v359_v29  ;;  %v260_v37 = vmul.f32 %v569_v0, %v641_v43  ;;  %422 = vst [vmem:[%s621_s30 + $0x60] sm:$0xff] %v390_v34  ;;  %vm327_vm14 = vcmp.ge.f32.partialorder %v294_v30, 0.0  ;;  %v360_v38 = vmul.f32 %v594_v13, %v294_v30 }
  0x27   : > { %423 = vst [vmem:[%s621_s30 + $0x68] sm:$0xff] %v391_v35  ;;  %vm328_vm15 = vcmp.ge.f32.partialorder %v295_v31, 0.0  ;;  %v361_v39 = vmul.f32 %v594_v13, %v295_v31  ;;  %v296_v40 = vadd.f32 %v581_v1, %v257_v32  ;;  %v297_v41 = vadd.f32 %v581_v1, %v258_v33 }
  0x28   : > { %v298_v50 = vadd.f32 %v581_v1, %v259_v36  ;;  %v299_v42 = vadd.f32 %v581_v1, %v260_v37  ;;  %v392_v51 = vsel %vm327_vm14, %v294_v30, %v360_v38  ;;  %v261_v43 = vmul.f32 %v569_v0, %v644_v44 }
  0x29   : > { %v393_v52 = vsel %vm328_vm15, %v295_v31, %v361_v39  ;;  %v262_v56 = vmul.f32 %v569_v0, %v647_v45  ;;  %424 = vst [vmem:[%s621_s30 + $0x70] sm:$0xff] %v392_v51  ;;  %vm329_vm0 = vcmp.ge.f32.partialorder %v296_v40, 0.0  ;;  %v362_v57 = vmul.f32 %v594_v13, %v296_v40 }
  0x2a   : > { %425 = vst [vmem:[%s621_s30 + $0x78] sm:$0xff] %v393_v52  ;;  %vm330_vm1 = vcmp.ge.f32.partialorder %v297_v41, 0.0  ;;  %v363_v58 = vmul.f32 %v594_v13, %v297_v41  ;;  %vm331_vm2 = vcmp.ge.f32.partialorder %v298_v50, 0.0  ;;  %v364_v59 = vmul.f32 %v594_v13, %v298_v50 }
  0x2b   : > { %vm332_vm3 = vcmp.ge.f32.partialorder %v299_v42, 0.0  ;;  %v365_v44 = vmul.f32 %v594_v13, %v299_v42  ;;  %v394_v63 = vsel %vm329_vm0, %v296_v40, %v362_v57  ;;  %v300_v45 = vadd.f32 %v581_v1, %v261_v43 }
  0x2c   : > { %v395_v2 = vsel %vm330_vm1, %v297_v41, %v363_v58  ;;  %v301_v3 = vadd.f32 %v581_v1, %v262_v56  ;;  %426 = vst [vmem:[%s621_s30 + $0x80] sm:$0xff] %v394_v63  ;;  %v396_v4 = vsel %vm331_vm2, %v298_v50, %v364_v59  ;;  %v263_v6 = vmul.f32 %v569_v0, %v650_v46 }
  0x2d   : > { %427 = vst [vmem:[%s621_s30 + $0x88] sm:$0xff] %v395_v2  ;;  %v397_v5 = vsel %vm332_vm3, %v299_v42, %v365_v44  ;;  %v264_v7 = vmul.f32 %v569_v0, %v653_v47  ;;  %428 = vst [vmem:[%s621_s30 + $0x90] sm:$0xff] %v396_v4  ;;  %vm333_vm4 = vcmp.ge.f32.partialorder %v300_v45, 0.0  ;;  %v366_v8 = vmul.f32 %v594_v13, %v300_v45 }
  0x2e   : > { %429 = vst [vmem:[%s621_s30 + $0x98] sm:$0xff] %v397_v5  ;;  %vm334_vm5 = vcmp.ge.f32.partialorder %v301_v3, 0.0  ;;  %v367_v9 = vmul.f32 %v594_v13, %v301_v3  ;;  %v302_v10 = vadd.f32 %v581_v1, %v263_v6  ;;  %v265_v46 = vmul.f32 %v569_v0, %v656_v48 }
  0x2f   : > { %v303_v11 = vadd.f32 %v581_v1, %v264_v7  ;;  %v266_v12 = vmul.f32 %v569_v0, %v659_v49  ;;  %v398_v47 = vsel %vm333_vm4, %v300_v45, %v366_v8  ;;  %v267_v15 = vmul.f32 %v569_v0, %v665_v53 }
  0x30   : > { %v399_v14 = vsel %vm334_vm5, %v301_v3, %v367_v9  ;;  %v268_v16 = vmul.f32 %v569_v0, %v668_v54  ;;  %430 = vst [vmem:[%s621_s30 + $0xa0] sm:$0xff] %v398_v47  ;;  %vm335_vm6 = vcmp.ge.f32.partialorder %v302_v10, 0.0  ;;  %v368_v17 = vmul.f32 %v594_v13, %v302_v10 }
  0x31   : > { %431 = vst [vmem:[%s621_s30 + $0xa8] sm:$0xff] %v399_v14  ;;  %vm336_vm7 = vcmp.ge.f32.partialorder %v303_v11, 0.0  ;;  %v369_v48 = vmul.f32 %v594_v13, %v303_v11  ;;  %v304_v49 = vadd.f32 %v581_v1, %v265_v46  ;;  %v305_v18 = vadd.f32 %v581_v1, %v266_v12 }
  0x32   : > { %v306_v19 = vadd.f32 %v581_v1, %v267_v15  ;;  %v307_v53 = vadd.f32 %v581_v1, %v268_v16  ;;  %v400_v20 = vsel %vm335_vm6, %v302_v10, %v368_v17  ;;  %v269_v54 = vmul.f32 %v569_v0, %v671_v55 }
  0x33   : > { %v401_v21 = vsel %vm336_vm7, %v303_v11, %v369_v48  ;;  %v270_v22 = vmul.f32 %v569_v0, %v678_v60  ;;  %432 = vst [vmem:[%s621_s30 + $0xb0] sm:$0xff] %v400_v20  ;;  %vm337_vm8 = vcmp.ge.f32.partialorder %v304_v49, 0.0  ;;  %v370_v23 = vmul.f32 %v594_v13, %v304_v49 }
  0x34   : > { %433 = vst [vmem:[%s621_s30 + $0xb8] sm:$0xff] %v401_v21  ;;  %vm338_vm9 = vcmp.ge.f32.partialorder %v305_v18, 0.0  ;;  %v371_v24 = vmul.f32 %v594_v13, %v305_v18  ;;  %vm339_vm10 = vcmp.ge.f32.partialorder %v306_v19, 0.0  ;;  %v372_v25 = vmul.f32 %v594_v13, %v306_v19 }
  0x35   : > { %vm340_vm11 = vcmp.ge.f32.partialorder %v307_v53, 0.0  ;;  %v373_v55 = vmul.f32 %v594_v13, %v307_v53  ;;  %v402_v26 = vsel %vm337_vm8, %v304_v49, %v370_v23  ;;  %v308_v60 = vadd.f32 %v581_v1, %v269_v54 }
  0x36   : > { %v403_v27 = vsel %vm338_vm9, %v305_v18, %v371_v24  ;;  %v309_v28 = vadd.f32 %v581_v1, %v270_v22  ;;  %434 = vst [vmem:[%s621_s30 + $0xc0] sm:$0xff] %v402_v26  ;;  %v404_v29 = vsel %vm339_vm10, %v306_v19, %v372_v25  ;;  %v271_v31 = vmul.f32 %v569_v0, %v681_v61 }
  0x37   : > { %435 = vst [vmem:[%s621_s30 + $0xc8] sm:$0xff] %v403_v27  ;;  %v405_v30 = vsel %vm340_vm11, %v307_v53, %v373_v55  ;;  %v272_v32 = vmul.f32 %v569_v0, %v684_v62  ;;  %436 = vst [vmem:[%s621_s30 + $0xd0] sm:$0xff] %v404_v29  ;;  %vm341_vm12 = vcmp.ge.f32.partialorder %v308_v60, 0.0  ;;  %v374_v33 = vmul.f32 %v594_v13, %v308_v60 }
  0x38   : > { %437 = vst [vmem:[%s621_s30 + $0xd8] sm:$0xff] %v405_v30  ;;  %vm342_vm13 = vcmp.ge.f32.partialorder %v309_v28, 0.0  ;;  %v375_v34 = vmul.f32 %v594_v13, %v309_v28  ;;  %v310_v35 = vadd.f32 %v581_v1, %v271_v31 }
  0x39   : > { %v311_v36 = vadd.f32 %v581_v1, %v272_v32  ;;  %v406_v37 = vsel %vm341_vm12, %v308_v60, %v374_v33 }
  0x3a   : > { %v407_v38 = vsel %vm342_vm13, %v309_v28, %v375_v34  ;;  %438 = vst [vmem:[%s621_s30 + $0xe0] sm:$0xff] %v406_v37  ;;  %vm343_vm14 = vcmp.ge.f32.partialorder %v310_v35, 0.0  ;;  %v376_v0 = vmul.f32 %v594_v13, %v310_v35 }
  0x3b   : > { %439 = vst [vmem:[%s621_s30 + $0xe8] sm:$0xff] %v407_v38  ;;  %vm344_vm15 = vcmp.ge.f32.partialorder %v311_v36, 0.0  ;;  %v377_v61 = vmul.f32 %v594_v13, %v311_v36 }
  0x3c   : > { %v408_v62 = vsel %vm343_vm14, %v310_v35, %v376_v0 }
  0x3d   : > { %v409_v39 = vsel %vm344_vm15, %v311_v36, %v377_v61  ;;  %440 = vst [vmem:[%s621_s30 + $0xf0] sm:$0xff] %v408_v62 }
  0x3e   : > { %441 = vst [vmem:[%s621_s30 + $0xf8] sm:$0xff] %v409_v39 }
  0x3f PF: > { %s15_s17 = sadd.s32 1, %s525_s17  }
  0x40   : > { %p12_p4 = scmp.ge.s32.totalorder %s15_s17, 4  }
  0x42   :  { %14 = sbr.rel (!%p12_p4) target bundleno = 2 (0x2), region = 66 }

// kernel: conv_layer_forward.2
= control target key start
LH: loop header
LB: loop body
LE: loop exit
PB: predicated region body
PF: predicated region fallthrough
CT: control target
= control target key end

     0   :  { %s4622_s12 = smov 0   ;;  %s4624_s13 = smov 0   ;;  %s5804_s0 = inlined_call_operand.vmem [shape: f32[2,18,18,8], index: 0, kind: input, shape index: {}]   ;;  %s5805_s1 = inlined_call_operand.vmem [shape: f32[9,8,128], index: 1, kind: input, shape index: {}]   ;;  %s5806_s2 = inlined_call_operand.vmem [shape: f32[512,128], index: 2, kind: output, shape index: {0}]   ;;  %s5807_s3 = inlined_call_operand.vmem [shape: f32[2,1,8,128], index: 3, kind: output, shape index: {1}]  }
   0x1   :  { %s4626_s14 = smov 0  }
   0x2 LB: > { %s26_s15 = sadd.s32 1, %s4596_s13  ;;  %p3245_p0 = scmp.ge.s32.totalorder %s4600_s14, 1  ;;  %s4600_s14 = sphi %s4626_s14, %s14_s14   ;;  %s4596_s13 = sphi %s4624_s13, %s5983_s13   ;;  %s4592_s12 = sphi %s4622_s12, %s5982_s12  }
   0x3   : > { %p28_p1 = scmp.ge.s32.totalorder %s26_s15, 2  ;;  %p156_p2 = scmp.lt.s32.totalorder %s4600_s14, 3 }
   0x5   : > { %s5985_s15 = smov (%p28_p1, %s26_s15), 0  ;;  %p157_p3 = pnand %p3245_p0, %p156_p2 }
   0x7   : > { %160 = sbr.rel (%p157_p3) target bundleno = 548 (0x224), region = 28 }
   0xe   : > { %v3250_v0 = vld [vmem:[%s5805_s1 + $0x8] sm:$0xff]  ;;  %v4648_v1 = vld [vmem:[%s5805_s1 + $0x20] sm:$0xff]  ;;  %p188_p4 = scmp.lt.s32.totalorder %s4592_s12, 1  ;;  %vm314_vm0 = vcmask 1046528   ;;  %vm397_vm1 = vcmask 64512   ;;  %v4731_v33 = vld [vmem:[%s5805_s1 + $0x30] sm:$0xff] }
   0xf   : > { %v265_v2 = vld [vmem:[%s5805_s1] sm:$0xff]  ;;  %3845 = vmatprep.subr.mxu1 %v3250_v0  ;;  %4045 = vmatprep.subr.mxu0 %v4648_v1  ;;  %v3414_v3 = vld [vmem:[%s5805_s1 + $0x28] sm:$0xff]  ;;  %v4740_v35 = vld [vmem:[%s5805_s1 + $0x10] sm:$0xff]  ;;  %vm976_vm2 = vcmask 1045504   ;;  %s3247_s16 = sshll.u32 %s4592_s12, 5 }
  0x10   : > { %3846 = vmatpush3.msra.mxu1 %v3250_v0  ;;  %4046 = vmatpush3.msra.mxu0 %v4648_v1  ;;  %s4660_s24 = scalar_select %p188_p4, %s4592_s12, 1 }
  0x11   : > { %3895 = vmatprep.subr.mxu1 %v265_v2  ;;  %4095 = vmatprep.subr.mxu0 %v3414_v3  ;;  %p195_p5 = scmp.lt.s32.totalorder %s3247_s16, 63 }
  0x12   : > { %s4553_s25 = smul.u32 432, %s4660_s24  ;;  %s3249_s12 = sshll.u32 %s4660_s24, 3 }
  0x13   : > { %s5987_s16 = smov (!%p195_p5, %s3247_s16), 63  ;;  %s207_s23 = scalar_lea.vmem %s5807_s3, %s3249_s12 }
  0x14   : > { %s4666_s28 = scalar_lea.vmem %s5804_s0, %s4553_s25  ;;  %s3248_s17 = sshll.u32 %s5987_s16, 3 }
  0x15   : > { %v4669_v4 = vld [vmem:[%s4666_s28] sm:$0xff]  ;;  %v4672_v5 = vld [vmem:[%s4666_s28 + $0x8] sm:$0xff]  ;;  %v4675_v6 = vld [vmem:[%s4666_s28 + $0x18] sm:$0xff]  ;;  %s5751_s20 = scalar_lea.vmem %s5806_s2, %s3248_s17 }
  0x16   : > { %5881 = vst [vmem:[#allocation2_spill] sm:$0xff] %v4675_v6  ;;  %v315_v7 = vrot.slane %v4669_v4, 1  ;;  %v316_v8 = vrot.slane %v4672_v5, 1  ;;  %v4680_v9 = vld [vmem:[%s4666_s28 + $0x20] sm:$0xff]  ;;  %v320_v10 = vrot.slane %v4675_v6, 1  ;;  %v4692_v15 = vld [vmem:[%s4666_s28 + $0x30] sm:$0xff] }
  0x17   : > { %5882 = vst [vmem:[#allocation3_spill] sm:$0xff] %v4680_v9  ;;  %v4684_v11 = vld [vmem:[%s4666_s28 + $0x10] sm:$0x3]  ;;  %v321_v12 = vrot.slane %v4680_v9, 1  ;;  %v4689_v14 = vld [vmem:[%s4666_s28 + $0x28] sm:$0x3] }
  0x18   : > { %v318_v13 = vrot.slane %v4684_v11, 1  ;;  %v317_v16 = vsel %vm314_vm0, %v315_v7, %v316_v8  ;;  %v323_v17 = vrot.slane %v4689_v14, 1  ;;  %v4697_v18 = vld [vmem:[%s4666_s28 + $0x38] sm:$0xff]  ;;  %v325_v19 = vrot.slane %v4692_v15, 1  ;;  %v4701_v20 = vld [vmem:[%s4666_s28 + $0x40] sm:$0x3] }
  0x19   : > { %3847 = vmatprep.mubr.msk.f32.mxu1 %vm397_vm1, %v317_v16  ;;  %v322_v21 = vsel %vm314_vm0, %v320_v10, %v321_v12  ;;  %v326_v23 = vrot.slane %v4697_v18, 1  ;;  %v328_v24 = vrot.slane %v4701_v20, 1  ;;  %v4709_v25 = vld [vmem:[%s4666_s28 + $0x48] sm:$0xff]  ;;  %v4712_v26 = vld [vmem:[%s4666_s28 + $0x50] sm:$0xff]  ;;  %v4715_v27 = vld [vmem:[%s4666_s28 + $0x58] sm:$0x3] }
  0x1a   : > { %v319_v22 = vsel %vm314_vm0, %v316_v8, %v318_v13  ;;  %4047 = vmatprep.mubr.msk.f32.mxu0 %vm397_vm1, %v322_v21  ;;  %v324_v28 = vsel %vm314_vm0, %v321_v12, %v323_v17  ;;  %v330_v29 = vrot.slane %v4709_v25, 1  ;;  %v331_v30 = vrot.slane %v4712_v26, 1  ;;  %v4723_v31 = vld [vmem:[%s4666_s28 + $0x60] sm:$0xff]  ;;  %v4726_v32 = vld [vmem:[%s4666_s28 + $0x68] sm:$0xff]  ;;  %v4755_v41 = vld [vmem:[%s4666_s28 + $0x70] sm:$0x3] }
  0x1b   : > { %3848 = vmatmul.mubr.msk.f32.vlgmr.msra.gmra.mrb[0].mxu1 %vm397_vm1, %v319_v22  ;;  %4048 = vmatmul.mubr.msk.f32.vlgmr.msra.gmra.mrb[0].mxu0 %vm397_vm1, %v324_v28  ;;  %v4735_v34 = vsel %vm314_vm0, %v325_v19, %v326_v23  ;;  %v4744_v36 = vsel %vm314_vm0, %v326_v23, %v328_v24  ;;  %v333_v37 = vrot.slane %v4715_v27, 1  ;;  %v335_v39 = vrot.slane %v4723_v31, 1  ;;  %v4760_v42 = vld [vmem:[%s4666_s28 + $0x78] sm:$0xff]  ;;  %v4763_v43 = vld [vmem:[%s4666_s28 + $0x80] sm:$0xff]  ;;  %v4782_v49 = vld [vmem:[%s4666_s28 + $0x88] sm:$0x3] }
  0x1c   : > { %3896 = vmatpush3.msra.mxu1 %v265_v2  ;;  %5883 = vst [vmem:[#allocation4_spill] sm:$0xff] %v4735_v34  ;;  %4096 = vmatpush3.msra.mxu0 %v3414_v3  ;;  %5884 = vst [vmem:[#allocation5_spill] sm:$0xff] %v4744_v36  ;;  %v4750_v38 = vsel %vm314_vm0, %v330_v29, %v331_v30  ;;  %v336_v40 = vrot.slane %v4726_v32, 1  ;;  %v338_v45 = vrot.slane %v4755_v41, 1  ;;  %v340_v47 = vrot.slane %v4760_v42, 1  ;;  %v4787_v50 = vld [vmem:[%s4666_s28 + $0x90] sm:$0xff] }
  0x1d   : > { %3850 = vmatprep.mubr.msk.f32.mxu1 %vm397_vm1, %v322_v21  ;;  %4050 = vmatprep.mubr.msk.f32.mxu0 %vm397_vm1, %v4735_v34  ;;  %5885 = vst [vmem:[#allocation6_spill] sm:$0xff] %v4750_v38  ;;  %v4773_v44 = vsel %vm314_vm0, %v331_v30, %v333_v37  ;;  %v341_v48 = vrot.slane %v4763_v43, 1  ;;  %v4790_v51 = vld [vmem:[%s4666_s28 + $0x98] sm:$0xff]  ;;  %v343_v53 = vrot.slane %v4782_v49, 1  ;;  %v345_v55 = vrot.slane %v4787_v50, 1  ;;  %v4813_v58 = vld [vmem:[%s4666_s28 + $0xa8] sm:$0xff] }
  0x1e   : > { %4145 = vmatprep.subr.mxu0 %v4731_v33  ;;  %3945 = vmatprep.subr.mxu1 %v4740_v35  ;;  %5886 = vst [vmem:[#allocation7_spill] sm:$0xff] %v4773_v44  ;;  %v4777_v46 = vsel %vm314_vm0, %v335_v39, %v336_v40  ;;  %v4799_v52 = vsel %vm314_vm0, %v336_v40, %v338_v45  ;;  %v346_v56 = vrot.slane %v4790_v51, 1  ;;  %v4808_v57 = vld [vmem:[%s4666_s28 + $0xa0] sm:$0x3]  ;;  %v4816_v59 = vld [vmem:[%s4666_s28 + $0xb0] sm:$0xff]  ;;  %v350_v63 = vrot.slane %v4813_v58, 1 }
  0x1f   : > { %3851 = vmatmul.mubr.msk.f32.gmra.mrb[2].mxu1 %vm397_vm1, %v324_v28  ;;  %4051 = vmatmul.mubr.msk.f32.gmra.mrb[2].mxu0 %vm397_vm1, %v4744_v36  ;;  %5887 = vst [vmem:[#allocation8_spill] sm:$0xff] %v4777_v46  ;;  %5888 = vst [vmem:[#allocation9_spill] sm:$0xff] %v4799_v52  ;;  %v4803_v54 = vsel %vm314_vm0, %v340_v47, %v341_v48  ;;  %v4825_v60 = vsel %vm314_vm0, %v341_v48, %v343_v53  ;;  %v348_v61 = vrot.slane %v4808_v57, 1  ;;  %v4834_v2 = vld [vmem:[%s4666_s28 + $0xb8] sm:$0x3]  ;;  %v4839_v3 = vld [vmem:[%s4666_s28 + $0xc0] sm:$0xff] }
  0x20   : > { %3853 = vmatprep.mubr.msk.f32.mxu1 %vm397_vm1, %v4735_v34  ;;  %4053 = vmatprep.mubr.msk.f32.mxu0 %vm397_vm1, %v4750_v38  ;;  %5889 = vst [vmem:[#allocation10_spill] sm:$0xff] %v4803_v54  ;;  %5890 = vst [vmem:[#allocation11_spill] sm:$0xff] %v4825_v60  ;;  %v4829_v62 = vsel %vm314_vm0, %v345_v55, %v346_v56  ;;  %v351_v0 = vrot.slane %v4816_v59, 1  ;;  %v4842_v7 = vld [vmem:[%s4666_s28 + $0xc8] sm:$0xff]  ;;  %v353_v10 = vrot.slane %v4834_v2, 1  ;;  %v355_v13 = vrot.slane %v4839_v3, 1 }
  0x21   : > { %5891 = vst [vmem:[#allocation12_spill] sm:$0xff] %v4829_v62  ;;  %v4851_v8 = vsel %vm314_vm0, %v346_v56, %v348_v61  ;;  %v356_v16 = vrot.slane %v4842_v7, 1  ;;  %v4860_v17 = vld [vmem:[%s4666_s28 + $0xd0] sm:$0x3]  ;;  %v982_v23 = vrot.slane %v4675_v6, 2  ;;  %v983_v24 = vrot.slane %v4680_v9, 2 }
  0x22   : > { %5892 = vst [vmem:[#allocation13_spill] sm:$0xff] %v4851_v8  ;;  %v4855_v12 = vsel %vm314_vm0, %v350_v63, %v351_v0  ;;  %v4871_v19 = vsel %vm314_vm0, %v351_v0, %v353_v10  ;;  %v358_v21 = vrot.slane %v4860_v17, 1  ;;  %v4880_v28 = vld [vmem:[%s4666_s28 + $0xd8] sm:$0xff]  ;;  %v4883_v29 = vld [vmem:[%s4666_s28 + $0xe0] sm:$0xff]  ;;  %v985_v30 = vrot.slane %v4689_v14, 2  ;;  %v4908_v53 = vld [vmem:[%s4666_s28 + $0xf0] sm:$0xff] }
  0x23   : > { %3854 = vmatmul.mubr.msk.f32.gmra.mrb[4].mxu1 %vm397_vm1, %v4744_v36  ;;  %4054 = vmatmul.mubr.msk.f32.gmra.mrb[4].mxu0 %vm397_vm1, %v4773_v44  ;;  %5893 = vst [vmem:[#allocation14_spill] sm:$0xff] %v4855_v12  ;;  %5894 = vst [vmem:[#allocation15_spill] sm:$0xff] %v4871_v19  ;;  %v4875_v22 = vsel %vm314_vm0, %v355_v13, %v356_v16  ;;  %v360_v39 = vrot.slane %v4880_v28, 1  ;;  %v361_v40 = vrot.slane %v4883_v29, 1  ;;  %v4900_v45 = vld [vmem:[%s4666_s28 + $0xe8] sm:$0x3] }
  0x24   : > { %3856 = vmatprep.mubr.msk.f32.mxu1 %vm397_vm1, %v4750_v38  ;;  %4056 = vmatprep.mubr.msk.f32.mxu0 %vm397_vm1, %v4777_v46  ;;  %5895 = vst [vmem:[#allocation16_spill] sm:$0xff] %v4875_v22  ;;  %v4895_v37 = vsel %vm314_vm0, %v356_v16, %v358_v21  ;;  %v4903_v47 = vsel %vm976_vm2, %v982_v23, %v983_v24  ;;  %v987_v48 = vrot.slane %v4692_v15, 2  ;;  %v988_v14 = vrot.slane %v4697_v18, 2  ;;  %v4911_v55 = vld [vmem:[%s4666_s28 + $0xf8] sm:$0xff]  ;;  %v4932_v16 = vld [vmem:[%s4666_s28 + $0x100] sm:$0x3] }
  0x25   : > { %5896 = vst [vmem:[#allocation17_spill] sm:$0xff] %v4895_v37  ;;  %v363_v56 = vrot.slane %v4900_v45, 1  ;;  %v990_v61 = vrot.slane %v4701_v20, 2  ;;  %v4924_v63 = vsel %vm976_vm2, %v983_v24, %v985_v30  ;;  %v4927_v0 = vsel %vm314_vm0, %v360_v39, %v361_v40  ;;  %v4943_v24 = vld [vmem:[%s4666_s28 + $0x110] sm:$0xff]  ;;  %v4950_v30 = vld [vmem:[%s5805_s1 + $0x38] sm:$0xff] }
  0x26   : > { %5897 = vst [vmem:[#allocation18_spill] sm:$0xff] %v4927_v0  ;;  %v365_v10 = vrot.slane %v4908_v53, 1  ;;  %v366_v13 = vrot.slane %v4911_v55, 1  ;;  %v4935_v21 = vsel %vm976_vm2, %v987_v48, %v988_v14  ;;  %v992_v20 = vrot.slane %v4709_v25, 2  ;;  %v5044_v36 = vld [vmem:[%s4666_s28 + $0x148] sm:$0x3] }
  0x27   : > { %3857 = vmatmul.mubr.msk.f32.gmra.mrb[6].mxu1 %vm397_vm1, %v4773_v44  ;;  %4057 = vmatmul.mubr.msk.f32.gmra.mrb[6].mxu0 %vm397_vm1, %v4799_v52  ;;  %v993_v23 = vrot.slane %v4712_v26, 2  ;;  %v4957_v39 = vsel %vm314_vm0, %v361_v40, %v363_v56  ;;  %v4960_v48 = vsel %vm976_vm2, %v988_v14, %v990_v61  ;;  %v371_v40 = vrot.slane %v4943_v24, 1  ;;  %v4973_v56 = vld [vmem:[%s4666_s28 + $0x118] sm:$0x3] }
  0x28   : > { %3859 = vmatprep.mubr.msk.f32.mxu1 %vm397_vm1, %v4777_v46  ;;  %4059 = vmatprep.mubr.msk.f32.mxu0 %vm397_vm1, %v4803_v54  ;;  %5898 = vst [vmem:[#allocation19_spill] sm:$0xff] %v4957_v39  ;;  %5899 = vst [vmem:[#allocation20_spill] sm:$0xff] %v4960_v48  ;;  %v997_v61 = vrot.slane %v4723_v31, 2  ;;  %v5017_v46 = vld [vmem:[%s4666_s28 + $0x138] sm:$0xff]  ;;  %v1005_v44 = vrot.slane %v4782_v49, 2  ;;  %v1010_v34 = vrot.slane %v4808_v57, 2 }
  0x29   : > { %v4976_v14 = vsel %vm976_vm2, %v992_v20, %v993_v23  ;;  %v373_v20 = vrot.slane %v4973_v56, 1  ;;  %v380_v38 = vrot.slane %v5017_v46, 1  ;;  %v1012_v57 = vrot.slane %v4813_v58, 2 }
  0x2a   : > { %5901 = vst [vmem:[#allocation22_spill] sm:$0xff] %v4976_v14 }
  0x2b   : > { %3860 = vmatmul.mubr.msk.f32.gmra.mrb[8].mxu1 %vm397_vm1, %v4799_v52  ;;  %4060 = vmatmul.mubr.msk.f32.gmra.mrb[8].mxu0 %vm397_vm1, %v4825_v60  ;;  %v5009_v52 = vld [vmem:[%s4666_s28 + $0x130] sm:$0x3] }
  0x2c   : > { %3862 = vmatprep.mubr.msk.f32.mxu1 %vm397_vm1, %v4803_v54  ;;  %4062 = vmatprep.mubr.msk.f32.mxu0 %vm397_vm1, %v4829_v62 }
  0x2f   : > { %3863 = vmatmul.mubr.msk.f32.gmra.mrb[10].mxu1 %vm397_vm1, %v4825_v60  ;;  %4063 = vmatmul.mubr.msk.f32.gmra.mrb[10].mxu0 %vm397_vm1, %v4851_v8 }
  0x30   : > { %3865 = vmatprep.mubr.msk.f32.mxu1 %vm397_vm1, %v4829_v62  ;;  %4065 = vmatprep.mubr.msk.f32.mxu0 %vm397_vm1, %v4855_v12  ;;  %v1000_v62 = vrot.slane %v4755_v41, 2  ;;  %v1002_v41 = vrot.slane %v4760_v42, 2 }
  0x33   : > { %3866 = vmatmul.mubr.msk.f32.gmra.mrb[12].mxu1 %vm397_vm1, %v4851_v8  ;;  %4066 = vmatmul.mubr.msk.f32.gmra.mrb[12].mxu0 %vm397_vm1, %v4871_v19  ;;  %v4981_v8 = vld [vmem:[%s4666_s28 + $0x120] sm:$0xff] }
  0x34   : > { %3868 = vmatprep.mubr.msk.f32.mxu1 %vm397_vm1, %v4855_v12  ;;  %4068 = vmatprep.mubr.msk.f32.mxu0 %vm397_vm1, %v4875_v22  ;;  %v995_v12 = vrot.slane %v4715_v27, 2  ;;  %v375_v54 = vrot.slane %v4981_v8, 1 }
  0x36   : > { %v5001_v60 = vsel %vm976_vm2, %v993_v23, %v995_v12  ;;  %v5020_v12 = vld [vmem:[%s4666_s28 + $0x140] sm:$0xff] }
  0x37   : > { %3869 = vmatmul.mubr.msk.f32.gmra.mrb[14].mxu1 %vm397_vm1, %v4871_v19  ;;  %4069 = vmatmul.mubr.msk.f32.gmra.mrb[14].mxu0 %vm397_vm1, %v4895_v37  ;;  %v4967_v19 = vsel %vm314_vm0, %v365_v10, %v366_v13  ;;  %v4984_v10 = vld [vmem:[%s4666_s28 + $0x128] sm:$0xff]  ;;  %5903 = vst [vmem:[#allocation24_spill] sm:$0xff] %v5001_v60 }
  0x38   : > { %3871 = vmatprep.mubr.msk.f32.mxu1 %vm397_vm1, %v4875_v22  ;;  %4097 = vmatprep.mubr.msk.f32.mxu0 %vm397_vm1, %v4903_v47  ;;  %v4940_v22 = vld [vmem:[%s4666_s28 + $0x108] sm:$0xff]  ;;  %5900 = vst [vmem:[#allocation21_spill] sm:$0xff] %v4967_v19 }
  0x3b   : > { %3872 = vmatmul.mubr.msk.f32.gmra.mrb[16].mxu1 %vm397_vm1, %v4895_v37  ;;  %4098 = vmatmul.mubr.msk.f32.vlgmr.msra.gmra.mrb[0].mxu0 %vm397_vm1, %v4924_v63  ;;  %v368_v37 = vrot.slane %v4932_v16, 1 }
  0x3c   : > { %3874 = vmatprep.mubr.msk.f32.mxu1 %vm397_vm1, %v4927_v0  ;;  %4146 = vmatpush3.msra.mxu0 %v4731_v33  ;;  %v370_v0 = vrot.slane %v4940_v22, 1  ;;  %v998_v33 = vrot.slane %v4726_v32, 2 }
  0x3d   : > { %4100 = vmatprep.mubr.msk.f32.mxu0 %vm397_vm1, %v4935_v21  ;;  %4195 = vmatprep.subr.mxu0 %v4950_v30  ;;  %v4994_v27 = vsel %vm314_vm0, %v366_v13, %v368_v37  ;;  %v1003_v13 = vrot.slane %v4763_v43, 2 }
  0x3e   : > { %5902 = vst [vmem:[#allocation23_spill] sm:$0xff] %v4994_v27  ;;  %v5012_v37 = vsel %vm976_vm2, %v997_v61, %v998_v33  ;;  %v5032_v23 = vsel %vm976_vm2, %v998_v33, %v1000_v62  ;;  %v378_v61 = vrot.slane %v5009_v52, 1  ;;  %v1007_v62 = vrot.slane %v4787_v50, 2 }
  0x3f   : > { %3875 = vmatmul.mubr.msk.f32.gmra.mrb[18].mxu1 %vm397_vm1, %v4957_v39  ;;  %4101 = vmatmul.mubr.msk.f32.gmra.mrb[2].mxu0 %vm397_vm1, %v4960_v48  ;;  %v5004_v39 = vsel %vm314_vm0, %v370_v0, %v371_v40  ;;  %5905 = vst [vmem:[#allocation26_spill] sm:$0xff] %v5012_v37  ;;  %v5029_v0 = vsel %vm314_vm0, %v371_v40, %v373_v20  ;;  %5907 = vst [vmem:[#allocation28_spill] sm:$0xff] %v5032_v23  ;;  %v1008_v33 = vrot.slane %v4790_v51, 2  ;;  %v5052_v20 = vld [vmem:[%s4666_s28 + $0x150] sm:$0xff]  ;;  %v5114_v48 = vld [vmem:[%s4666_s28 + $0x178] sm:$0x3] }
  0x40   : > { %3877 = vmatprep.mubr.msk.f32.mxu1 %vm397_vm1, %v4967_v19  ;;  %4103 = vmatprep.mubr.msk.f32.mxu0 %vm397_vm1, %v4976_v14  ;;  %5904 = vst [vmem:[#allocation25_spill] sm:$0xff] %v5004_v39  ;;  %v376_v19 = vrot.slane %v4984_v10, 1  ;;  %5906 = vst [vmem:[#allocation27_spill] sm:$0xff] %v5029_v0  ;;  %v5047_v40 = vsel %vm976_vm2, %v1002_v41, %v1003_v13  ;;  %v383_v41 = vrot.slane %v5044_v36, 1 }
  0x41   : > { %5909 = vst [vmem:[#allocation30_spill] sm:$0xff] %v5047_v40 }
  0x42   : > { %v5064_v49 = vsel %vm314_vm0, %v376_v19, %v378_v61  ;;  %v1013_v61 = vrot.slane %v4816_v59, 2 }
  0x43   : > { %3878 = vmatmul.mubr.msk.f32.gmra.mrb[20].mxu1 %vm397_vm1, %v4994_v27  ;;  %4104 = vmatmul.mubr.msk.f32.gmra.mrb[4].mxu0 %vm397_vm1, %v5001_v60  ;;  %v5038_v27 = vsel %vm314_vm0, %v375_v54, %v376_v19  ;;  %v5055_v54 = vld [vmem:[%s4666_s28 + $0x158] sm:$0xff]  ;;  %5910 = vst [vmem:[#allocation31_spill] sm:$0xff] %v5064_v49  ;;  %v5079_v60 = vld [vmem:[%s4666_s28 + $0x160] sm:$0x3]  ;;  %v5082_v19 = vsel %vm976_vm2, %v1007_v62, %v1008_v33 }
  0x44   : > { %3880 = vmatprep.mubr.msk.f32.mxu1 %vm397_vm1, %v5004_v39  ;;  %4106 = vmatprep.mubr.msk.f32.mxu0 %vm397_vm1, %v5012_v37  ;;  %5908 = vst [vmem:[#allocation29_spill] sm:$0xff] %v5038_v27  ;;  %v381_v39 = vrot.slane %v5020_v12, 1  ;;  %v5071_v37 = vsel %vm976_vm2, %v1003_v13, %v1005_v44  ;;  %v5090_v44 = vld [vmem:[%s4666_s28 + $0x170] sm:$0xff]  ;;  %v5102_v13 = vsel %vm976_vm2, %v1008_v33, %v1010_v34  ;;  %v388_v62 = vrot.slane %v5079_v60, 1 }
  0x45   : > { %5911 = vst [vmem:[#allocation32_spill] sm:$0xff] %v5071_v37  ;;  %5913 = vst [vmem:[#allocation34_spill] sm:$0xff] %v5090_v44  ;;  %v1017_v34 = vrot.slane %v4839_v3, 2  ;;  %v1018_v33 = vrot.slane %v4842_v7, 2 }
  0x46   : > { %5915 = vst [vmem:[#allocation36_spill] sm:$0xff] %v5102_v13 }
  0x47   : > { %3881 = vmatmul.mubr.msk.f32.gmra.mrb[22].mxu1 %vm397_vm1, %v5029_v0  ;;  %4107 = vmatmul.mubr.msk.f32.gmra.mrb[6].mxu0 %vm397_vm1, %v5032_v23  ;;  %v5074_v0 = vsel %vm314_vm0, %v380_v38, %v381_v39  ;;  %v385_v23 = vrot.slane %v5052_v20, 1  ;;  %v5099_v38 = vsel %vm314_vm0, %v381_v39, %v383_v41  ;;  %v5117_v39 = vsel %vm976_vm2, %v1012_v57, %v1013_v61 }
  0x48   : > { %3883 = vmatprep.mubr.msk.f32.mxu1 %vm397_vm1, %v5038_v27  ;;  %4109 = vmatprep.mubr.msk.f32.mxu0 %vm397_vm1, %v5047_v40  ;;  %5912 = vst [vmem:[#allocation33_spill] sm:$0xff] %v5074_v0  ;;  %v386_v27 = vrot.slane %v5055_v54, 1  ;;  %v5087_v40 = vld [vmem:[%s4666_s28 + $0x168] sm:$0xff]  ;;  %5914 = vst [vmem:[#allocation35_spill] sm:$0xff] %v5099_v38 }
  0x4a   : > { %v5108_v14 = vsel %vm314_vm0, %v385_v23, %v386_v27  ;;  %v393_v23 = vrot.slane %v5114_v48, 1 }
  0x4b   : > { %3884 = vmatmul.mubr.msk.f32.gmra.mrb[24].mxu1 %vm397_vm1, %v5064_v49  ;;  %4110 = vmatmul.mubr.msk.f32.gmra.mrb[8].mxu0 %vm397_vm1, %v5071_v37  ;;  %5916 = vst [vmem:[#allocation37_spill] sm:$0xff] %v5108_v14  ;;  %v1015_v49 = vrot.slane %v4834_v2, 2  ;;  %v390_v37 = vrot.slane %v5087_v40, 1  ;;  %v5128_v2 = vsel %vm314_vm0, %v386_v27, %v388_v62  ;;  %v1023_v27 = vrot.slane %v4883_v29, 2 }
  0x4c   : > { %3886 = vmatprep.mubr.msk.f32.mxu1 %vm397_vm1, %v5074_v0  ;;  %4112 = vmatprep.mubr.msk.f32.mxu0 %vm397_vm1, %v5082_v19  ;;  %v391_v0 = vrot.slane %v5090_v44, 1  ;;  %5917 = vst [vmem:[#allocation38_spill] sm:$0xff] %v5128_v2  ;;  %v1027_v62 = vrot.slane %v4908_v53, 2 }
  0x4d   : > { %v5134_v41 = vsel %vm976_vm2, %v1013_v61, %v1015_v49  ;;  %v1025_v49 = vrot.slane %v4900_v45, 2 }
  0x4e   : > { %v5137_v57 = vsel %vm314_vm0, %v390_v37, %v391_v0  ;;  %v5152_v37 = vsel %vm314_vm0, %v391_v0, %v393_v23  ;;  %v5187_v23 = vld [vmem:[%s5805_s1 + $0x18] sm:$0xff] }
  0x4f   : > { %3887 = vmatmul.mubr.msk.f32.gmra.mrb[26].mxu1 %vm397_vm1, %v5099_v38  ;;  %4113 = vmatmul.mubr.msk.f32.gmra.mrb[10].mxu0 %vm397_vm1, %v5102_v13  ;;  %5918 = vst [vmem:[#allocation39_spill] sm:$0xff] %v5137_v57  ;;  %v1020_v38 = vrot.slane %v4860_v17, 2  ;;  %v5141_v13 = vsel %vm976_vm2, %v1017_v34, %v1018_v33  ;;  %5919 = vst [vmem:[#allocation40_spill] sm:$0xff] %v5152_v37  ;;  %v1028_v34 = vrot.slane %v4911_v55, 2 }
  0x50   : > { %3889 = vmatprep.mubr.msk.f32.mxu1 %vm397_vm1, %v5108_v14  ;;  %4115 = vmatprep.mubr.msk.f32.mxu0 %vm397_vm1, %v5117_v39  ;;  %v1022_v14 = vrot.slane %v4880_v28, 2  ;;  %v5174_v45 = vsel %vm976_vm2, %v1023_v27, %v1025_v49 }
  0x51   : > { %v5157_v17 = vsel %vm976_vm2, %v1018_v33, %v1020_v38  ;;  %v5178_v0 = vsel %vm976_vm2, %v1027_v62, %v1028_v34  ;;  %v1032_v38 = vrot.slane %v4940_v22, 2  ;;  %v1033_v33 = vrot.slane %v4943_v24, 2 }
  0x52   : > { %v5161_v61 = vsel %vm976_vm2, %v1022_v14, %v1023_v27  ;;  %v1030_v14 = vrot.slane %v4932_v16, 2  ;;  %v1035_v27 = vrot.slane %v4973_v56, 2  ;;  %v1037_v62 = vrot.slane %v4981_v8, 2 }
  0x53   : > { %3890 = vmatmul.mubr.msk.f32.gmra.mrb[28].mxu1 %vm397_vm1, %v5128_v2  ;;  %4116 = vmatmul.mubr.msk.f32.gmra.mrb[12].mxu0 %vm397_vm1, %v5134_v41  ;;  %v5201_v49 = vsel %vm976_vm2, %v1032_v38, %v1033_v33  ;;  %v1042_v38 = vrot.slane %v5017_v46, 2  ;;  %v1053_v2 = vrot.slane %v5090_v44, 2 }
  0x54   : > { %3892 = vmatprep.mubr.msk.f32.mxu1 %vm397_vm1, %v5137_v57  ;;  %4118 = vmatprep.mubr.msk.f32.mxu0 %vm397_vm1, %v5141_v13  ;;  %v5197_v16 = vsel %vm976_vm2, %v1028_v34, %v1030_v14  ;;  %5920 = vst [vmem:[#allocation41_spill] sm:$0xff] %v5201_v49  ;;  %v5215_v56 = vsel %vm976_vm2, %v1033_v33, %v1035_v27  ;;  %v1040_v34 = vrot.slane %v5009_v52, 2  ;;  %v1045_v33 = vrot.slane %v5044_v36, 2 }
  0x55   : > { %v1048_v57 = vrot.slane %v5055_v54, 2 }
  0x57   : > { %3893 = vmatmul.mubr.msk.f32.gmra.mrb[30].mxu1 %vm397_vm1, %v5152_v37  ;;  %4119 = vmatmul.mubr.msk.f32.gmra.mrb[14].mxu0 %vm397_vm1, %v5157_v17  ;;  %v1043_v37 = vrot.slane %v5020_v12, 2 }
  0x58   : > { %3897 = vmatprep.mubr.msk.f32.mxu1 %vm397_vm1, %v4669_v4  ;;  %4121 = vmatprep.mubr.msk.f32.mxu0 %vm397_vm1, %v5161_v61 }
  0x59   : > { %v5236_v27 = vsel %vm976_vm2, %v1042_v38, %v1043_v37  ;;  %v5249_v36 = vsel %vm976_vm2, %v1043_v37, %v1045_v33  ;;  %v1052_v38 = vrot.slane %v5087_v40, 2  ;;  %v1055_v37 = vrot.slane %v5114_v48, 2 }
  0x5a   : > { %5922 = vst [vmem:[#allocation43_spill] sm:$0xff] %v5236_v27  ;;  %5923 = vst [vmem:[#allocation44_spill] sm:$0xff] %v5249_v36 }
  0x5b   : > { %3898 = vmatmul.mubr.msk.f32.vlgmr.msra.gmra.mrb[0].mxu1 %vm397_vm1, %v4672_v5  ;;  %4122 = vmatmul.mubr.msk.f32.gmra.mrb[16].mxu0 %vm397_vm1, %v5174_v45  ;;  %v5276_v33 = vsel %vm976_vm2, %v1052_v38, %v1053_v2  ;;  %v5292_v48 = vsel %vm976_vm2, %v1053_v2, %v1055_v37  ;;  %v978_v38 = vrot.slane %v4672_v5, 2  ;;  %v980_v37 = vrot.slane %v4684_v11, 2  ;;  %v5930_v5 = vld [vmem:[#allocation20_spill] sm:$0xff]  ;;  %v5931_v11 = vld [vmem:[#allocation22_spill] sm:$0xff] }
  0x5c   : > { %3946 = vmatpush3.msra.mxu1 %v4740_v35  ;;  %3900 = vmatprep.mubr.msk.f32.mxu1 %vm397_vm1, %v4675_v6  ;;  %v1038_v35 = vrot.slane %v4984_v10, 2  ;;  %v5263_v6 = vld [vmem:[%s4666_s28 + $0x188] sm:$0xff]  ;;  %5926 = vst [vmem:[#allocation47_spill] sm:$0xff] %v5276_v33  ;;  %5927 = vst [vmem:[#allocation48_spill] sm:$0xff] %v5292_v48 }
  0x5d   : > { %4124 = vmatprep.mubr.msk.f32.mxu0 %vm397_vm1, %v5178_v0  ;;  %3995 = vmatprep.subr.mxu1 %v5187_v23 }
  0x5e   : > { %v5219_v14 = vsel %vm976_vm2, %v1037_v62, %v1038_v35  ;;  %v5232_v52 = vsel %vm976_vm2, %v1038_v35, %v1040_v34  ;;  %v1047_v62 = vrot.slane %v5052_v20, 2  ;;  %v1050_v35 = vrot.slane %v5079_v60, 2 }
  0x5f   : > { %3901 = vmatmul.mubr.msk.f32.gmra.mrb[2].mxu1 %vm397_vm1, %v4680_v9  ;;  %4125 = vmatmul.mubr.msk.f32.gmra.mrb[18].mxu0 %vm397_vm1, %v5197_v16  ;;  %5921 = vst [vmem:[#allocation42_spill] sm:$0xff] %v5232_v52  ;;  %v5260_v9 = vld [vmem:[%s4666_s28 + $0x180] sm:$0xff] }
  0x60   : > { %3903 = vmatprep.mubr.msk.f32.mxu1 %vm397_vm1, %v4692_v15  ;;  %4127 = vmatprep.mubr.msk.f32.mxu0 %vm397_vm1, %v5201_v49  ;;  %v5253_v34 = vsel %vm976_vm2, %v1047_v62, %v1048_v57  ;;  %v5272_v60 = vsel %vm976_vm2, %v1048_v57, %v1050_v35  ;;  %v1914_v62 = vrot.slane %v5260_v9, 2 }
  0x61   : > { %5924 = vst [vmem:[#allocation45_spill] sm:$0xff] %v5253_v34  ;;  %5925 = vst [vmem:[#allocation46_spill] sm:$0xff] %v5272_v60 }
  0x63   : > { %3904 = vmatmul.mubr.msk.f32.gmra.mrb[4].mxu1 %vm397_vm1, %v4697_v18  ;;  %4128 = vmatmul.mubr.msk.f32.gmra.mrb[20].mxu0 %vm397_vm1, %v5215_v56 }
  0x64   : > { %3906 = vmatprep.mubr.msk.f32.mxu1 %vm397_vm1, %v4709_v25  ;;  %4130 = vmatprep.mubr.msk.f32.mxu0 %vm397_vm1, %v5219_v14 }
  0x67   : > { %3907 = vmatmul.mubr.msk.f32.gmra.mrb[6].mxu1 %vm397_vm1, %v4712_v26  ;;  %4131 = vmatmul.mubr.msk.f32.gmra.mrb[22].mxu0 %vm397_vm1, %v5232_v52  ;;  %v5281_v52 = vld [vmem:[%s4666_s28 + $0x190] sm:$0x3] }
  0x68   : > { %3909 = vmatprep.mubr.msk.f32.mxu1 %vm397_vm1, %v4723_v31  ;;  %4133 = vmatprep.mubr.msk.f32.mxu0 %vm397_vm1, %v5236_v27  ;;  %v1915_v27 = vrot.slane %v5263_v6, 2  ;;  %v1917_v57 = vrot.slane %v5281_v52, 2 }
  0x6a   : > { %v5296_v35 = vsel %vm976_vm2, %v1914_v62, %v1915_v27  ;;  %v5307_v2 = vsel %vm976_vm2, %v1915_v27, %v1917_v57  ;;  %v5322_v27 = vld [vmem:[%s5805_s1 + $0x40] sm:$0xff] }
  0x6b   : > { %3910 = vmatmul.mubr.msk.f32.gmra.mrb[8].mxu1 %vm397_vm1, %v4726_v32  ;;  %4134 = vmatmul.mubr.msk.f32.gmra.mrb[24].mxu0 %vm397_vm1, %v5249_v36  ;;  %5928 = vst [vmem:[#allocation49_spill] sm:$0xff] %v5296_v35  ;;  %5929 = vst [vmem:[#allocation50_spill] sm:$0xff] %v5307_v2  ;;  %v5935_v57 = vld [vmem:[#allocation30_spill] sm:$0xff] }
  0x6c   : > { %3912 = vmatprep.mubr.msk.f32.mxu1 %vm397_vm1, %v4760_v42  ;;  %4136 = vmatprep.mubr.msk.f32.mxu0 %vm397_vm1, %v5253_v34 }
  0x6f   : > { %3913 = vmatmul.mubr.msk.f32.gmra.mrb[10].mxu1 %vm397_vm1, %v4763_v43  ;;  %4137 = vmatmul.mubr.msk.f32.gmra.mrb[26].mxu0 %vm397_vm1, %v5272_v60 }
  0x70   : > { %3915 = vmatprep.mubr.msk.f32.mxu1 %vm397_vm1, %v4787_v50  ;;  %4139 = vmatprep.mubr.msk.f32.mxu0 %vm397_vm1, %v5276_v33 }
  0x73   : > { %3916 = vmatmul.mubr.msk.f32.gmra.mrb[12].mxu1 %vm397_vm1, %v4790_v51  ;;  %4140 = vmatmul.mubr.msk.f32.gmra.mrb[28].mxu0 %vm397_vm1, %v5292_v48 }
  0x74   : > { %3918 = vmatprep.mubr.msk.f32.mxu1 %vm397_vm1, %v4813_v58  ;;  %4142 = vmatprep.mubr.msk.f32.mxu0 %vm397_vm1, %v5296_v35  ;;  %v5940_v35 = vld [vmem:[#allocation6_spill] sm:$0xff] }
  0x77   : > { %3919 = vmatmul.mubr.msk.f32.gmra.mrb[14].mxu1 %vm397_vm1, %v4816_v59  ;;  %4143 = vmatmul.mubr.msk.f32.gmra.mrb[30].mxu0 %vm397_vm1, %v5307_v2  ;;  %v5939_v2 = vld [vmem:[#allocation5_spill] sm:$0xff] }
  0x78   : > { %3921 = vmatprep.mubr.msk.f32.mxu1 %vm397_vm1, %v4839_v3  ;;  %4147 = vmatprep.mubr.msk.f32.mxu0 %vm397_vm1, %v4692_v15 }
  0x7b   : > { %3922 = vmatmul.mubr.msk.f32.gmra.mrb[16].mxu1 %vm397_vm1, %v4842_v7  ;;  %4148 = vmatmul.mubr.msk.f32.vlgmr.msra.gmra.mrb[0].mxu0 %vm397_vm1, %v4697_v18 }
  0x7c   : > { %3924 = vmatprep.mubr.msk.f32.mxu1 %vm397_vm1, %v4880_v28  ;;  %4196 = vmatpush3.msra.mxu0 %v4950_v30  ;;  %v977_v30 = vrot.slane %v4669_v4, 2  ;;  %v981_v4 = vsel %vm976_vm2, %v978_v38, %v980_v37  ;;  %v5937_v37 = vld [vmem:[#allocation36_spill] sm:$0xff] }
  0x7d   : > { %4150 = vmatprep.mubr.msk.f32.mxu0 %vm397_vm1, %v4709_v25  ;;  %4245 = vmatprep.subr.mxu0 %v5322_v27 }
  0x7e   : > { %v979_v62 = vsel %vm976_vm2, %v977_v30, %v978_v38  ;;  %v5936_v30 = vld [vmem:[#allocation32_spill] sm:$0xff]  ;;  %v5442_v38 = vld [vmem:[%s4666_s28 + $0x198] sm:$0xff] }
  0x7f   : > { %3925 = vmatmul.mubr.msk.f32.gmra.mrb[18].mxu1 %vm397_vm1, %v4883_v29  ;;  %4151 = vmatmul.mubr.msk.f32.gmra.mrb[2].mxu0 %vm397_vm1, %v4712_v26 }
  0x80   : > { %3927 = vmatprep.mubr.msk.f32.mxu1 %vm397_vm1, %v4908_v53  ;;  %4153 = vmatprep.mubr.msk.f32.mxu0 %vm397_vm1, %v4723_v31 }
  0x83   : > { %3928 = vmatmul.mubr.msk.f32.gmra.mrb[20].mxu1 %vm397_vm1, %v4911_v55  ;;  %4154 = vmatmul.mubr.msk.f32.gmra.mrb[4].mxu0 %vm397_vm1, %v4726_v32 }
  0x84   : > { %3930 = vmatprep.mubr.msk.f32.mxu1 %vm397_vm1, %v4940_v22  ;;  %4156 = vmatprep.mubr.msk.f32.mxu0 %vm397_vm1, %v4760_v42 }
  0x87   : > { %3931 = vmatmul.mubr.msk.f32.gmra.mrb[22].mxu1 %vm397_vm1, %v4943_v24  ;;  %4157 = vmatmul.mubr.msk.f32.gmra.mrb[6].mxu0 %vm397_vm1, %v4763_v43 }
  0x88   : > { %3933 = vmatprep.mubr.msk.f32.mxu1 %vm397_vm1, %v4981_v8  ;;  %4159 = vmatprep.mubr.msk.f32.mxu0 %vm397_vm1, %v4787_v50 }
  0x8b   : > { %3934 = vmatmul.mubr.msk.f32.gmra.mrb[24].mxu1 %vm397_vm1, %v4984_v10  ;;  %4160 = vmatmul.mubr.msk.f32.gmra.mrb[8].mxu0 %vm397_vm1, %v4790_v51 }
  0x8c   : > { %3936 = vmatprep.mubr.msk.f32.mxu1 %vm397_vm1, %v5017_v46  ;;  %4162 = vmatprep.mubr.msk.f32.mxu0 %vm397_vm1, %v4813_v58 }
  0x8f   : > { %3937 = vmatmul.mubr.msk.f32.gmra.mrb[26].mxu1 %vm397_vm1, %v5020_v12  ;;  %4163 = vmatmul.mubr.msk.f32.gmra.mrb[10].mxu0 %vm397_vm1, %v4816_v59 }
  0x90   : > { %3939 = vmatprep.mubr.msk.f32.mxu1 %vm397_vm1, %v5052_v20  ;;  %4165 = vmatprep.mubr.msk.f32.mxu0 %vm397_vm1, %v4839_v3 }
  0x93   : > { %3940 = vmatmul.mubr.msk.f32.gmra.mrb[28].mxu1 %vm397_vm1, %v5055_v54  ;;  %4166 = vmatmul.mubr.msk.f32.gmra.mrb[12].mxu0 %vm397_vm1, %v4842_v7 }
  0x94   : > { %3942 = vmatprep.mubr.msk.f32.mxu1 %vm397_vm1, %v5087_v40  ;;  %4168 = vmatprep.mubr.msk.f32.mxu0 %vm397_vm1, %v4880_v28 }
  0x97   : > { %3943 = vmatmul.mubr.msk.f32.gmra.mrb[30].mxu1 %vm397_vm1, %v5090_v44  ;;  %4169 = vmatmul.mubr.msk.f32.gmra.mrb[14].mxu0 %vm397_vm1, %v4883_v29 }
  0x98   : > { %3947 = vmatprep.mubr.msk.f32.mxu1 %vm397_vm1, %v979_v62  ;;  %4171 = vmatprep.mubr.msk.f32.mxu0 %vm397_vm1, %v4908_v53  ;;  %v5453_v62 = vld [vmem:[%s4666_s28 + $0x1a0] sm:$0xff] }
  0x9b   : > { %3948 = vmatmul.mubr.msk.f32.vlgmr.msra.gmra.mrb[0].mxu1 %vm397_vm1, %v981_v4  ;;  %4172 = vmatmul.mubr.msk.f32.gmra.mrb[16].mxu0 %vm397_vm1, %v4911_v55  ;;  %v5938_v4 = vld [vmem:[#allocation4_spill] sm:$0xff] }
  0x9c   : > { %3996 = vmatpush3.msra.mxu1 %v5187_v23  ;;  %3950 = vmatprep.mubr.msk.f32.mxu1 %vm397_vm1, %v4903_v47  ;;  %v5932_v47 = vld [vmem:[#allocation24_spill] sm:$0xff] }
  0x9d   : > { %4174 = vmatprep.mubr.msk.f32.mxu0 %vm397_vm1, %v4940_v22  ;;  %4295 = vmatprep.subr.mxu1 %v4648_v1  ;;  %v5934_v23 = vld [vmem:[#allocation28_spill] sm:$0xff] }
  0x9f   : > { %3951 = vmatmul.mubr.msk.f32.gmra.mrb[2].mxu1 %vm397_vm1, %v4924_v63  ;;  %4175 = vmatmul.mubr.msk.f32.gmra.mrb[18].mxu0 %vm397_vm1, %v4943_v24  ;;  %v5933_v63 = vld [vmem:[#allocation26_spill] sm:$0xff] }
  0xa0   : > { %3953 = vmatprep.mubr.msk.f32.mxu1 %vm397_vm1, %v4935_v21  ;;  %4177 = vmatprep.mubr.msk.f32.mxu0 %vm397_vm1, %v4981_v8 }
  0xa3   : > { %3954 = vmatmul.mubr.msk.f32.gmra.mrb[4].mxu1 %vm397_vm1, %v5930_v5  ;;  %4178 = vmatmul.mubr.msk.f32.gmra.mrb[20].mxu0 %vm397_vm1, %v4984_v10 }
  0xa4   : > { %3956 = vmatprep.mubr.msk.f32.mxu1 %vm397_vm1, %v5931_v11  ;;  %4180 = vmatprep.mubr.msk.f32.mxu0 %vm397_vm1, %v5017_v46 }
  0xa7   : > { %3957 = vmatmul.mubr.msk.f32.gmra.mrb[6].mxu1 %vm397_vm1, %v5932_v47  ;;  %4181 = vmatmul.mubr.msk.f32.gmra.mrb[22].mxu0 %vm397_vm1, %v5020_v12 }
  0xa8   : > { %3959 = vmatprep.mubr.msk.f32.mxu1 %vm397_vm1, %v5933_v63  ;;  %4183 = vmatprep.mubr.msk.f32.mxu0 %vm397_vm1, %v5052_v20 }
  0xab   : > { %3960 = vmatmul.mubr.msk.f32.gmra.mrb[8].mxu1 %vm397_vm1, %v5934_v23  ;;  %4184 = vmatmul.mubr.msk.f32.gmra.mrb[24].mxu0 %vm397_vm1, %v5055_v54 }
  0xac   : > { %3962 = vmatprep.mubr.msk.f32.mxu1 %vm397_vm1, %v5935_v57  ;;  %4186 = vmatprep.mubr.msk.f32.mxu0 %vm397_vm1, %v5087_v40 }
  0xaf   : > { %3963 = vmatmul.mubr.msk.f32.gmra.mrb[10].mxu1 %vm397_vm1, %v5936_v30  ;;  %4187 = vmatmul.mubr.msk.f32.gmra.mrb[26].mxu0 %vm397_vm1, %v5090_v44  ;;  %v5941_v44 = vld [vmem:[#allocation7_spill] sm:$0xff] }
  0xb0   : > { %3965 = vmatprep.mubr.msk.f32.mxu1 %vm397_vm1, %v5082_v19  ;;  %4189 = vmatprep.mubr.msk.f32.mxu0 %vm397_vm1, %v5260_v9 }
  0xb3   : > { %3966 = vmatmul.mubr.msk.f32.gmra.mrb[12].mxu1 %vm397_vm1, %v5937_v37  ;;  %4190 = vmatmul.mubr.msk.f32.gmra.mrb[28].mxu0 %vm397_vm1, %v5263_v6 }
  0xb4   : > { %3968 = vmatprep.mubr.msk.f32.mxu1 %vm397_vm1, %v5117_v39  ;;  %4192 = vmatprep.mubr.msk.f32.mxu0 %vm397_vm1, %v5442_v38 }
  0xb7   : > { %3969 = vmatmul.mubr.msk.f32.gmra.mrb[14].mxu1 %vm397_vm1, %v5134_v41  ;;  %4193 = vmatmul.mubr.msk.f32.gmra.mrb[30].mxu0 %vm397_vm1, %v5453_v62 }
  0xb8   : > { %3971 = vmatprep.mubr.msk.f32.mxu1 %vm397_vm1, %v5141_v13  ;;  %4197 = vmatprep.mubr.msk.f32.mxu0 %vm397_vm1, %v5938_v4  ;;  %v5942_v4 = vld [vmem:[#allocation8_spill] sm:$0xff] }
  0xbb   : > { %3972 = vmatmul.mubr.msk.f32.gmra.mrb[16].mxu1 %vm397_vm1, %v5157_v17  ;;  %4198 = vmatmul.mubr.msk.f32.vlgmr.msra.gmra.mrb[0].mxu0 %vm397_vm1, %v5939_v2  ;;  %v5943_v2 = vld [vmem:[#allocation9_spill] sm:$0xff] }
  0xbc   : > { %3974 = vmatprep.mubr.msk.f32.mxu1 %vm397_vm1, %v5161_v61  ;;  %4246 = vmatpush3.msra.mxu0 %v5322_v27  ;;  %v5946_v27 = vld [vmem:[#allocation12_spill] sm:$0xff] }
  0xbd   : > { %4200 = vmatprep.mubr.msk.f32.mxu0 %vm397_vm1, %v5940_v35  ;;  %v5944_v35 = vld [vmem:[#allocation10_spill] sm:$0xff] }
  0xbf   : > { %3975 = vmatmul.mubr.msk.f32.gmra.mrb[18].mxu1 %vm397_vm1, %v5174_v45  ;;  %4201 = vmatmul.mubr.msk.f32.gmra.mrb[2].mxu0 %vm397_vm1, %v5941_v44  ;;  %v5945_v44 = vld [vmem:[#allocation11_spill] sm:$0xff] }
  0xc0   : > { %3977 = vmatprep.mubr.msk.f32.mxu1 %vm397_vm1, %v5178_v0  ;;  %4203 = vmatprep.mubr.msk.f32.mxu0 %vm397_vm1, %v5942_v4  ;;  %v5947_v4 = vld [vmem:[#allocation42_spill] sm:$0xff] }
  0xc3   : > { %3978 = vmatmul.mubr.msk.f32.gmra.mrb[20].mxu1 %vm397_vm1, %v5197_v16  ;;  %4204 = vmatmul.mubr.msk.f32.gmra.mrb[4].mxu0 %vm397_vm1, %v5943_v2  ;;  %v5948_v2 = vld [vmem:[#allocation13_spill] sm:$0xff] }
  0xc4   : > { %3980 = vmatprep.mubr.msk.f32.mxu1 %vm397_vm1, %v5201_v49  ;;  %4206 = vmatprep.mubr.msk.f32.mxu0 %vm397_vm1, %v5944_v35  ;;  %v5949_v49 = vld [vmem:[#allocation43_spill] sm:$0xff]  ;;  %v5950_v35 = vld [vmem:[#allocation14_spill] sm:$0xff] }
  0xc7   : > { %3981 = vmatmul.mubr.msk.f32.gmra.mrb[22].mxu1 %vm397_vm1, %v5215_v56  ;;  %4207 = vmatmul.mubr.msk.f32.gmra.mrb[6].mxu0 %vm397_vm1, %v5945_v44  ;;  %v5951_v44 = vld [vmem:[#allocation15_spill] sm:$0xff] }
  0xc8   : > { %3983 = vmatprep.mubr.msk.f32.mxu1 %vm397_vm1, %v5219_v14  ;;  %4209 = vmatprep.mubr.msk.f32.mxu0 %vm397_vm1, %v5946_v27  ;;  %v5952_v27 = vld [vmem:[#allocation16_spill] sm:$0xff] }
  0xcb   : > { %3984 = vmatmul.mubr.msk.f32.gmra.mrb[24].mxu1 %vm397_vm1, %v5947_v4  ;;  %4210 = vmatmul.mubr.msk.f32.gmra.mrb[8].mxu0 %vm397_vm1, %v5948_v2  ;;  %v5953_v2 = vld [vmem:[#allocation17_spill] sm:$0xff] }
  0xcc   : > { %3986 = vmatprep.mubr.msk.f32.mxu1 %vm397_vm1, %v5949_v49  ;;  %4212 = vmatprep.mubr.msk.f32.mxu0 %vm397_vm1, %v5950_v35  ;;  %v5954_v35 = vld [vmem:[#allocation18_spill] sm:$0xff] }
  0xcf   : > { %3987 = vmatmul.mubr.msk.f32.gmra.mrb[26].mxu1 %vm397_vm1, %v5249_v36  ;;  %4213 = vmatmul.mubr.msk.f32.gmra.mrb[10].mxu0 %vm397_vm1, %v5951_v44  ;;  %v5955_v44 = vld [vmem:[#allocation19_spill] sm:$0xff] }
  0xd0   : > { %3989 = vmatprep.mubr.msk.f32.mxu1 %vm397_vm1, %v5253_v34  ;;  %4215 = vmatprep.mubr.msk.f32.mxu0 %vm397_vm1, %v5952_v27  ;;  %v5956_v34 = vld [vmem:[#allocation2_spill] sm:$0xff]  ;;  %v5957_v27 = vld [vmem:[#allocation21_spill] sm:$0xff]  ;;  %v5578_v36 = vld [vmem:[%s4666_s28 + $0x1a8] sm:$0x3] }
  0xd3   : > { %3990 = vmatmul.mubr.msk.f32.gmra.mrb[28].mxu1 %vm397_vm1, %v5272_v60  ;;  %4216 = vmatmul.mubr.msk.f32.gmra.mrb[12].mxu0 %vm397_vm1, %v5953_v2  ;;  %v5958_v60 = vld [vmem:[#allocation3_spill] sm:$0xff] }
  0xd4   : > { %3992 = vmatprep.mubr.msk.f32.mxu1 %vm397_vm1, %v5276_v33  ;;  %4218 = vmatprep.mubr.msk.f32.mxu0 %vm397_vm1, %v5954_v35  ;;  %v5959_v2 = vld [vmem:[#allocation23_spill] sm:$0xff]  ;;  %v5967_v33 = vld [vmem:[#allocation38_spill] sm:$0xff] }
  0xd7   : > { %3993 = vmatmul.mubr.msk.f32.gmra.mrb[30].mxu1 %vm397_vm1, %v5292_v48  ;;  %4219 = vmatmul.mubr.msk.f32.gmra.mrb[14].mxu0 %vm397_vm1, %v5955_v44  ;;  %v5960_v48 = vld [vmem:[#allocation25_spill] sm:$0xff] }
  0xd8   : > { %3997 = vmatprep.mubr.msk.f32.mxu1 %vm397_vm1, %v5956_v34  ;;  %4221 = vmatprep.mubr.msk.f32.mxu0 %vm397_vm1, %v5957_v27  ;;  %v5961_v34 = vld [vmem:[#allocation27_spill] sm:$0xff] }
  0xdb   : > { %3998 = vmatmul.mubr.msk.f32.vlgmr.msra.gmra.mrb[0].mxu1 %vm397_vm1, %v5958_v60  ;;  %4222 = vmatmul.mubr.msk.f32.gmra.mrb[16].mxu0 %vm397_vm1, %v5959_v2  ;;  %v5962_v60 = vld [vmem:[#allocation29_spill] sm:$0xff] }
  0xdc   : > { %4296 = vmatpush3.msra.mxu1 %v4648_v1  ;;  %4000 = vmatprep.mubr.msk.f32.mxu1 %vm397_vm1, %v4692_v15  ;;  %v5963_v1 = vld [vmem:[#allocation31_spill] sm:$0xff]  ;;  %v5964_v15 = vld [vmem:[#allocation33_spill] sm:$0xff] }
  0xdd   : > { %4224 = vmatprep.mubr.msk.f32.mxu0 %vm397_vm1, %v5960_v48 }
  0xdf   : > { %4001 = vmatmul.mubr.msk.f32.gmra.mrb[2].mxu1 %vm397_vm1, %v4697_v18  ;;  %4225 = vmatmul.mubr.msk.f32.gmra.mrb[18].mxu0 %vm397_vm1, %v5961_v34  ;;  %v5965_v18 = vld [vmem:[#allocation35_spill] sm:$0xff] }
  0xe0   : > { %4003 = vmatprep.mubr.msk.f32.mxu1 %vm397_vm1, %v4709_v25  ;;  %4227 = vmatprep.mubr.msk.f32.mxu0 %vm397_vm1, %v5962_v60  ;;  %v5966_v25 = vld [vmem:[#allocation37_spill] sm:$0xff] }
  0xe3   : > { %4004 = vmatmul.mubr.msk.f32.gmra.mrb[4].mxu1 %vm397_vm1, %v4712_v26  ;;  %4228 = vmatmul.mubr.msk.f32.gmra.mrb[20].mxu0 %vm397_vm1, %v5963_v1  ;;  %v1646_v26 = vrot.slane %v5260_v9, 1 }
  0xe4   : > { %4006 = vmatprep.mubr.msk.f32.mxu1 %vm397_vm1, %v4723_v31  ;;  %4230 = vmatprep.mubr.msk.f32.mxu0 %vm397_vm1, %v5964_v15  ;;  %v1647_v31 = vrot.slane %v5263_v6, 1 }
  0xe6   : > { %v5575_v15 = vsel %vm314_vm0, %v1646_v26, %v1647_v31 }
  0xe7   : > { %4007 = vmatmul.mubr.msk.f32.gmra.mrb[6].mxu1 %vm397_vm1, %v4726_v32  ;;  %4231 = vmatmul.mubr.msk.f32.gmra.mrb[22].mxu0 %vm397_vm1, %v5965_v18  ;;  %v5968_v32 = vld [vmem:[#allocation39_spill] sm:$0xff]  ;;  %v2449_v18 = vrot.slane %v5453_v62, 1 }
  0xe8   : > { %4009 = vmatprep.mubr.msk.f32.mxu1 %vm397_vm1, %v4760_v42  ;;  %4233 = vmatprep.mubr.msk.f32.mxu0 %vm397_vm1, %v5966_v25  ;;  %v1649_v42 = vrot.slane %v5281_v52, 1  ;;  %v2448_v25 = vrot.slane %v5442_v38, 1  ;;  %v2451_v52 = vrot.slane %v5578_v36, 1 }
  0xea   : > { %v2450_v26 = vsel %vm314_vm0, %v2448_v25, %v2449_v18 }
  0xeb   : > { %4010 = vmatmul.mubr.msk.f32.gmra.mrb[8].mxu1 %vm397_vm1, %v4763_v43  ;;  %4234 = vmatmul.mubr.msk.f32.gmra.mrb[24].mxu0 %vm397_vm1, %v5967_v33  ;;  %v5969_v43 = vld [vmem:[#allocation40_spill] sm:$0xff] }
  0xec   : > { %4012 = vmatprep.mubr.msk.f32.mxu1 %vm397_vm1, %v4787_v50  ;;  %4236 = vmatprep.mubr.msk.f32.mxu0 %vm397_vm1, %v5968_v32  ;;  %v5589_v50 = vsel %vm314_vm0, %v1647_v31, %v1649_v42 }
  0xef   : > { %4013 = vmatmul.mubr.msk.f32.gmra.mrb[10].mxu1 %vm397_vm1, %v4790_v51  ;;  %4237 = vmatmul.mubr.msk.f32.gmra.mrb[26].mxu0 %vm397_vm1, %v5969_v43  ;;  %v2452_v51 = vsel %vm314_vm0, %v2449_v18, %v2451_v52 }
  0xf0   : > { %4015 = vmatprep.mubr.msk.f32.mxu1 %vm397_vm1, %v4813_v58  ;;  %4239 = vmatprep.mubr.msk.f32.mxu0 %vm397_vm1, %v5575_v15  ;;  %v5973_v58 = vld [vmem:[#allocation33_spill] sm:$0xff] }
  0xf3   : > { %4016 = vmatmul.mubr.msk.f32.gmra.mrb[12].mxu1 %vm397_vm1, %v4816_v59  ;;  %4240 = vmatmul.mubr.msk.f32.gmra.mrb[28].mxu0 %vm397_vm1, %v5589_v50  ;;  %v5974_v59 = vld [vmem:[#allocation45_spill] sm:$0xff] }
  0xf4   : > { %4018 = vmatprep.mubr.msk.f32.mxu1 %vm397_vm1, %v4839_v3  ;;  %4242 = vmatprep.mubr.msk.f32.mxu0 %vm397_vm1, %v2450_v26  ;;  %v5975_v3 = vld [vmem:[#allocation35_spill] sm:$0xff] }
  0xf7   : > { %4019 = vmatmul.mubr.msk.f32.gmra.mrb[14].mxu1 %vm397_vm1, %v4842_v7  ;;  %4243 = vmatmul.mubr.msk.f32.gmra.mrb[30].mxu0 %vm397_vm1, %v2452_v51  ;;  %v5976_v7 = vld [vmem:[#allocation46_spill] sm:$0xff] }
  0xf8   : > { %4021 = vmatprep.mubr.msk.f32.mxu1 %vm397_vm1, %v4880_v28  ;;  %4247 = vmatprep.mubr.msk.f32.mxu0 %vm397_vm1, %v4935_v21  ;;  %v2716_v28 = vrot.slane %v5442_v38, 2  ;;  %v2719_v21 = vrot.slane %v5578_v36, 2 }
  0xfb   : > { %4022 = vmatmul.mubr.msk.f32.gmra.mrb[16].mxu1 %vm397_vm1, %v4883_v29  ;;  %4248 = vmatmul.mubr.msk.f32.vlgmr.msra.gmra.mrb[0].mxu0 %vm397_vm1, %v5930_v5  ;;  %v2717_v29 = vrot.slane %v5453_v62, 2 }
  0xfc   : > { %4024 = vmatprep.mubr.msk.f32.mxu1 %vm397_vm1, %v4908_v53  ;;  %4250 = vmatprep.mubr.msk.f32.mxu0 %vm397_vm1, %v5931_v11  ;;  %v5979_v53 = vld [vmem:[#allocation48_spill] sm:$0xff] }
  0xff   : > { %4025 = vmatmul.mubr.msk.f32.gmra.mrb[18].mxu1 %vm397_vm1, %v4911_v55  ;;  %4251 = vmatmul.mubr.msk.f32.gmra.mrb[2].mxu0 %vm397_vm1, %v5932_v47  ;;  %v5980_v55 = vld [vmem:[#allocation49_spill] sm:$0xff] }
 0x100   : > { %4027 = vmatprep.mubr.msk.f32.mxu1 %vm397_vm1, %v4940_v22  ;;  %4253 = vmatprep.mubr.msk.f32.mxu0 %vm397_vm1, %v5933_v63  ;;  %v5978_v22 = vld [vmem:[#allocation47_spill] sm:$0xff] }
 0x103   : > { %4028 = vmatmul.mubr.msk.f32.gmra.mrb[20].mxu1 %vm397_vm1, %v4943_v24  ;;  %4254 = vmatmul.mubr.msk.f32.gmra.mrb[4].mxu0 %vm397_vm1, %v5934_v23  ;;  %v2718_v24 = vsel %vm976_vm2, %v2716_v28, %v2717_v29 }
 0x104   : > { %4030 = vmatprep.mubr.msk.f32.mxu1 %vm397_vm1, %v4981_v8  ;;  %4256 = vmatprep.mubr.msk.f32.mxu0 %vm397_vm1, %v5935_v57  ;;  %v5977_v8 = vld [vmem:[#allocation37_spill] sm:$0xff] }
 0x107   : > { %4031 = vmatmul.mubr.msk.f32.gmra.mrb[22].mxu1 %vm397_vm1, %v4984_v10  ;;  %4257 = vmatmul.mubr.msk.f32.gmra.mrb[6].mxu0 %vm397_vm1, %v5936_v30  ;;  %v5981_v10 = vld [vmem:[#allocation50_spill] sm:$0xff] }
 0x108   : > { %4033 = vmatprep.mubr.msk.f32.mxu1 %vm397_vm1, %v5017_v46  ;;  %4259 = vmatprep.mubr.msk.f32.mxu0 %vm397_vm1, %v5082_v19  ;;  %v5970_v46 = vld [vmem:[#allocation34_spill] sm:$0xff] }
 0x10b   : > { %4034 = vmatmul.mubr.msk.f32.gmra.mrb[24].mxu1 %vm397_vm1, %v5020_v12  ;;  %4260 = vmatmul.mubr.msk.f32.gmra.mrb[8].mxu0 %vm397_vm1, %v5937_v37  ;;  %v2720_v12 = vsel %vm976_vm2, %v2717_v29, %v2719_v21 }
 0x10c   : > { %4036 = vmatprep.mubr.msk.f32.mxu1 %vm397_vm1, %v5052_v20  ;;  %4262 = vmatprep.mubr.msk.f32.mxu0 %vm397_vm1, %v5117_v39 }
 0x10f   : > { %4037 = vmatmul.mubr.msk.f32.gmra.mrb[26].mxu1 %vm397_vm1, %v5055_v54  ;;  %4263 = vmatmul.mubr.msk.f32.gmra.mrb[10].mxu0 %vm397_vm1, %v5134_v41 }
 0x110   : > { %4039 = vmatprep.mubr.msk.f32.mxu1 %vm397_vm1, %v5087_v40  ;;  %4265 = vmatprep.mubr.msk.f32.mxu0 %vm397_vm1, %v5141_v13 }
 0x113   : > { %4040 = vmatmul.mubr.msk.f32.gmra.mrb[28].mxu1 %vm397_vm1, %v5970_v46  ;;  %4266 = vmatmul.mubr.msk.f32.gmra.mrb[12].mxu0 %vm397_vm1, %v5157_v17 }
 0x114   : > { %4042 = vmatprep.mubr.msk.f32.mxu1 %vm397_vm1, %v5260_v9  ;;  %4268 = vmatprep.mubr.msk.f32.mxu0 %vm397_vm1, %v5161_v61  ;;  %v5971_v9 = vld [vmem:[#allocation41_spill] sm:$0xff] }
 0x117   : > { %4043 = vmatmul.mubr.msk.f32.gmra.mrb[30].mxu1 %vm397_vm1, %v5263_v6  ;;  %4269 = vmatmul.mubr.msk.f32.gmra.mrb[14].mxu0 %vm397_vm1, %v5174_v45  ;;  %v5972_v6 = vld [vmem:[#allocation44_spill] sm:$0xff] }
 0x118   : > { %4071 = vmatprep.mubr.msk.f32.mxu1 %vm397_vm1, %v5954_v35  ;;  %4271 = vmatprep.mubr.msk.f32.mxu0 %vm397_vm1, %v5178_v0 }
 0x11b   : > { %4072 = vmatmul.mubr.msk.f32.vlgmr.msra.gmra.mrb[16].mxu1 %vm397_vm1, %v5955_v44  ;;  %4272 = vmatmul.mubr.msk.f32.gmra.mrb[16].mxu0 %vm397_vm1, %v5197_v16 }
 0x11c   : > { %4074 = vmatprep.mubr.msk.f32.mxu1 %vm397_vm1, %v5957_v27  ;;  %4274 = vmatprep.mubr.msk.f32.mxu0 %vm397_vm1, %v5971_v9 }
 0x11f   : > { %4075 = vmatmul.mubr.msk.f32.gmra.mrb[18].mxu1 %vm397_vm1, %v5959_v2  ;;  %4275 = vmatmul.mubr.msk.f32.gmra.mrb[18].mxu0 %vm397_vm1, %v5215_v56 }
 0x120   : > { %4077 = vmatprep.mubr.msk.f32.mxu1 %vm397_vm1, %v5960_v48  ;;  %4277 = vmatprep.mubr.msk.f32.mxu0 %vm397_vm1, %v5219_v14 }
 0x123   : > { %4078 = vmatmul.mubr.msk.f32.gmra.mrb[20].mxu1 %vm397_vm1, %v5961_v34  ;;  %4278 = vmatmul.mubr.msk.f32.gmra.mrb[20].mxu0 %vm397_vm1, %v5947_v4 }
 0x124   : > { %4080 = vmatprep.mubr.msk.f32.mxu1 %vm397_vm1, %v5962_v60  ;;  %4280 = vmatprep.mubr.msk.f32.mxu0 %vm397_vm1, %v5949_v49 }
 0x127   : > { %4081 = vmatmul.mubr.msk.f32.gmra.mrb[22].mxu1 %vm397_vm1, %v5963_v1  ;;  %4281 = vmatmul.mubr.msk.f32.gmra.mrb[22].mxu0 %vm397_vm1, %v5972_v6 }
 0x128   : > { %4083 = vmatprep.mubr.msk.f32.mxu1 %vm397_vm1, %v5973_v58  ;;  %4283 = vmatprep.mubr.msk.f32.mxu0 %vm397_vm1, %v5974_v59 }
 0x12b   : > { %4084 = vmatmul.mubr.msk.f32.gmra.mrb[24].mxu1 %vm397_vm1, %v5975_v3  ;;  %4284 = vmatmul.mubr.msk.f32.gmra.mrb[24].mxu0 %vm397_vm1, %v5976_v7 }
 0x12c   : > { %4086 = vmatprep.mubr.msk.f32.mxu1 %vm397_vm1, %v5977_v8  ;;  %4286 = vmatprep.mubr.msk.f32.mxu0 %vm397_vm1, %v5978_v22 }
 0x12f   : > { %4087 = vmatmul.mubr.msk.f32.gmra.mrb[26].mxu1 %vm397_vm1, %v5967_v33  ;;  %4287 = vmatmul.mubr.msk.f32.gmra.mrb[26].mxu0 %vm397_vm1, %v5979_v53 }
 0x130   : > { %4089 = vmatprep.mubr.msk.f32.mxu1 %vm397_vm1, %v5968_v32  ;;  %4289 = vmatprep.mubr.msk.f32.mxu0 %vm397_vm1, %v5980_v55 }
 0x133   : > { %4090 = vmatmul.mubr.msk.f32.gmra.mrb[28].mxu1 %vm397_vm1, %v5969_v43  ;;  %4290 = vmatmul.mubr.msk.f32.gmra.mrb[28].mxu0 %vm397_vm1, %v5981_v10 }
 0x134   : > { %4092 = vmatprep.mubr.msk.f32.mxu1 %vm397_vm1, %v5575_v15  ;;  %4292 = vmatprep.mubr.msk.f32.mxu0 %vm397_vm1, %v2718_v24 }
 0x137   : > { %4093 = vmatmul.mubr.msk.f32.gmra.mrb[30].mxu1 %vm397_vm1, %v5589_v50  ;;  %4293 = vmatmul.mubr.msk.f32.gmra.mrb[30].mxu0 %vm397_vm1, %v2720_v12 }
 0x1ae   : > { %v3999_v40 = vpop.f32.mrb[0].mxu1 }
 0x1af   : > { %v1454_v20 = vpop.f32.mrb[1].mxu1 }
 0x1b2   : > { %v4002_v54 = vpop.f32.mrb[2].mxu1 }
 0x1b3   : > { %v1464_v19 = vpop.f32.mrb[3].mxu1 }
 0x1b6   : > { %v4005_v13 = vpop.f32.mrb[4].mxu1 }
 0x1b7   : > { %v1474_v39 = vpop.f32.mrb[5].mxu1 }
 0x1ba   : > { %v4008_v41 = vpop.f32.mrb[6].mxu1 }
 0x1bb   : > { %v1484_v17 = vpop.f32.mrb[7].mxu1 }
 0x1be   : > { %v4011_v61 = vpop.f32.mrb[8].mxu1 }
 0x1bf   : > { %v1494_v45 = vpop.f32.mrb[9].mxu1 }
 0x1c2   : > { %v5736_v0 = vpop.f32.mrb[10].mxu1 }
 0x1c3   : > { %v5738_v16 = vpop.f32.mrb[11].mxu1 }
 0x1c6   : > { %v5740_v49 = vpop.f32.mrb[12].mxu1 }
 0x1c7   : > { %v5742_v56 = vpop.f32.mrb[13].mxu1 }
 0x1ca   : > { %v5744_v14 = vpop.f32.mrb[14].mxu1 }
 0x1cb   : > { %v5746_v36 = vpop.f32.mrb[15].mxu1 }
 0x1ce   : > { %v4249_v33 = vpop.f32.mrb[0].mxu0 }
 0x1cf   : > { %v4297_v48 = vadd.f32 %v4249_v33, %v3999_v40  ;;  %v2793_v5 = vpop.f32.mrb[1].mxu0 }
 0x1d0   : > { %v4298_v11 = vadd.f32 %v2793_v5, %v1454_v20 }
 0x1d1   : > { %2985 = vst [vmem:[%s5751_s20 + $0x8] sm:$0xff] %v4297_v48  ;;  %v3054_v47 = vmul.f32 %v4297_v48, %v4297_v48 }
 0x1d2   : > { %2984 = vst [vmem:[%s5751_s20] sm:$0xff] %v4298_v11  ;;  %v3016_v63 = vadd.f32 %v4298_v11, %v4297_v48  ;;  %v3053_v23 = vmul.f32 %v4298_v11, %v4298_v11  ;;  %v4252_v57 = vpop.f32.mrb[2].mxu0 }
 0x1d3   : > { %v4299_v30 = vadd.f32 %v4252_v57, %v4002_v54  ;;  %v2803_v38 = vpop.f32.mrb[3].mxu0 }
 0x1d4   : > { %v3085_v37 = vadd.f32 %v3054_v47, %v3053_v23  ;;  %v4300_v62 = vadd.f32 %v2803_v38, %v1464_v19 }
 0x1d5   : > { %2987 = vst [vmem:[%s5751_s20 + $0x18] sm:$0xff] %v4299_v30  ;;  %v3056_v34 = vmul.f32 %v4299_v30, %v4299_v30 }
 0x1d6   : > { %2986 = vst [vmem:[%s5751_s20 + $0x10] sm:$0xff] %v4300_v62  ;;  %v3017_v4 = vadd.f32 %v4300_v62, %v3016_v63  ;;  %v3055_v35 = vmul.f32 %v4300_v62, %v4300_v62  ;;  %v4255_v44 = vpop.f32.mrb[4].mxu0 }
 0x1d7   : > { %v4301_v27 = vadd.f32 %v4255_v44, %v4005_v13  ;;  %v2813_v2 = vpop.f32.mrb[5].mxu0 }
 0x1d8   : > { %v3086_v60 = vadd.f32 %v3085_v37, %v3055_v35  ;;  %v4302_v1 = vadd.f32 %v2813_v2, %v1474_v39  ;;  %v3018_v15 = vadd.f32 %v4299_v30, %v3017_v4 }
 0x1d9   : > { %2989 = vst [vmem:[%s5751_s20 + $0x28] sm:$0xff] %v4301_v27  ;;  %v3058_v50 = vmul.f32 %v4301_v27, %v4301_v27 }
 0x1da   : > { %2988 = vst [vmem:[%s5751_s20 + $0x20] sm:$0xff] %v4302_v1  ;;  %v3019_v18 = vadd.f32 %v4302_v1, %v3018_v15  ;;  %v3057_v25 = vmul.f32 %v4302_v1, %v4302_v1  ;;  %v3087_v31 = vadd.f32 %v3086_v60, %v3056_v34  ;;  %v4258_v32 = vpop.f32.mrb[6].mxu0 }
 0x1db   : > { %v4303_v42 = vadd.f32 %v4258_v32, %v4008_v41  ;;  %v2823_v43 = vpop.f32.mrb[7].mxu0 }
 0x1dc   : > { %v3088_v52 = vadd.f32 %v3087_v31, %v3057_v25  ;;  %v4304_v26 = vadd.f32 %v2823_v43, %v1484_v17  ;;  %v3020_v51 = vadd.f32 %v4301_v27, %v3019_v18 }
 0x1dd   : > { %2991 = vst [vmem:[%s5751_s20 + $0x38] sm:$0xff] %v4303_v42  ;;  %v3060_v7 = vmul.f32 %v4303_v42, %v4303_v42 }
 0x1de   : > { %2990 = vst [vmem:[%s5751_s20 + $0x30] sm:$0xff] %v4304_v26  ;;  %v3021_v46 = vadd.f32 %v4304_v26, %v3020_v51  ;;  %v3059_v9 = vmul.f32 %v4304_v26, %v4304_v26  ;;  %v3089_v6 = vadd.f32 %v3088_v52, %v3058_v50  ;;  %v4261_v58 = vpop.f32.mrb[8].mxu0 }
 0x1df   : > { %v4305_v59 = vadd.f32 %v4261_v58, %v4011_v61  ;;  %v2833_v3 = vpop.f32.mrb[9].mxu0 }
 0x1e0   : > { %v3090_v8 = vadd.f32 %v3089_v6, %v3059_v9  ;;  %v4306_v22 = vadd.f32 %v2833_v3, %v1494_v45  ;;  %v3022_v28 = vadd.f32 %v4303_v42, %v3021_v46 }
 0x1e1   : > { %2993 = vst [vmem:[%s5751_s20 + $0x48] sm:$0xff] %v4305_v59  ;;  %v3062_v12 = vmul.f32 %v4305_v59, %v4305_v59 }
 0x1e2   : > { %2992 = vst [vmem:[%s5751_s20 + $0x40] sm:$0xff] %v4306_v22  ;;  %v3023_v29 = vadd.f32 %v4306_v22, %v3022_v28  ;;  %v3061_v53 = vmul.f32 %v4306_v22, %v4306_v22  ;;  %v3091_v55 = vadd.f32 %v3090_v8, %v3060_v7  ;;  %v4264_v21 = vpop.f32.mrb[10].mxu0 }
 0x1e3   : > { %v4307_v24 = vadd.f32 %v4264_v21, %v5736_v0  ;;  %v2843_v10 = vpop.f32.mrb[11].mxu0 }
 0x1e4   : > { %v3092_v40 = vadd.f32 %v3091_v55, %v3061_v53  ;;  %v4308_v20 = vadd.f32 %v2843_v10, %v5738_v16  ;;  %v3024_v54 = vadd.f32 %v4305_v59, %v3023_v29 }
 0x1e5   : > { %2995 = vst [vmem:[%s5751_s20 + $0x58] sm:$0xff] %v4307_v24  ;;  %v3064_v45 = vmul.f32 %v4307_v24, %v4307_v24 }
 0x1e6   : > { %2994 = vst [vmem:[%s5751_s20 + $0x50] sm:$0xff] %v4308_v20  ;;  %v3025_v19 = vadd.f32 %v4308_v20, %v3024_v54  ;;  %v3063_v13 = vmul.f32 %v4308_v20, %v4308_v20  ;;  %v3093_v39 = vadd.f32 %v3092_v40, %v3062_v12  ;;  %v4267_v41 = vpop.f32.mrb[12].mxu0 }
 0x1e7   : > { %v4309_v17 = vadd.f32 %v4267_v41, %v5740_v49  ;;  %v2853_v61 = vpop.f32.mrb[13].mxu0 }
 0x1e8   : > { %v3094_v0 = vadd.f32 %v3093_v39, %v3063_v13  ;;  %v4310_v33 = vadd.f32 %v2853_v61, %v5742_v56  ;;  %v3026_v48 = vadd.f32 %v4307_v24, %v3025_v19 }
 0x1e9   : > { %2997 = vst [vmem:[%s5751_s20 + $0x68] sm:$0xff] %v4309_v17  ;;  %v3066_v57 = vmul.f32 %v4309_v17, %v4309_v17 }
 0x1ea   : > { %2996 = vst [vmem:[%s5751_s20 + $0x60] sm:$0xff] %v4310_v33  ;;  %v3027_v16 = vadd.f32 %v4310_v33, %v3026_v48  ;;  %v3065_v5 = vmul.f32 %v4310_v33, %v4310_v33  ;;  %v3095_v11 = vadd.f32 %v3094_v0, %v3064_v45  ;;  %v4270_v47 = vpop.f32.mrb[14].mxu0 }
 0x1eb   : > { %v4311_v63 = vadd.f32 %v4270_v47, %v5744_v14  ;;  %v2863_v23 = vpop.f32.mrb[15].mxu0 }
 0x1ec   : > { %v3096_v30 = vadd.f32 %v3095_v11, %v3065_v5  ;;  %v4312_v49 = vadd.f32 %v2863_v23, %v5746_v36  ;;  %v3028_v38 = vadd.f32 %v4309_v17, %v3027_v16 }
 0x1ed   : > { %2999 = vst [vmem:[%s5751_s20 + $0x78] sm:$0xff] %v4311_v63  ;;  %v3068_v34 = vmul.f32 %v4311_v63, %v4311_v63 }
 0x1ee   : > { %v4073_v56 = vpop.f32.mrb[16].mxu1  ;;  %2998 = vst [vmem:[%s5751_s20 + $0x70] sm:$0xff] %v4312_v49  ;;  %v3029_v37 = vadd.f32 %v4312_v49, %v3028_v38  ;;  %v3067_v62 = vmul.f32 %v4312_v49, %v4312_v49  ;;  %v3097_v4 = vadd.f32 %v3096_v30, %v3066_v57  ;;  %v4273_v35 = vpop.f32.mrb[16].mxu0 }
 0x1ef   : > { %v1803_v44 = vpop.f32.mrb[17].mxu1  ;;  %v4313_v27 = vadd.f32 %v4273_v35, %v4073_v56  ;;  %v2873_v2 = vpop.f32.mrb[17].mxu0 }
 0x1f0   : > { %v3098_v14 = vadd.f32 %v3097_v4, %v3067_v62  ;;  %v4314_v60 = vadd.f32 %v2873_v2, %v1803_v44  ;;  %v3030_v1 = vadd.f32 %v4311_v63, %v3029_v37 }
 0x1f1   : > { %3001 = vst [vmem:[%s5751_s20 + $0x88] sm:$0xff] %v4313_v27  ;;  %v3070_v50 = vmul.f32 %v4313_v27, %v4313_v27 }
 0x1f2   : > { %v4076_v36 = vpop.f32.mrb[18].mxu1  ;;  %3000 = vst [vmem:[%s5751_s20 + $0x80] sm:$0xff] %v4314_v60  ;;  %v3031_v15 = vadd.f32 %v4314_v60, %v3030_v1  ;;  %v3069_v18 = vmul.f32 %v4314_v60, %v4314_v60  ;;  %v3099_v25 = vadd.f32 %v3098_v14, %v3068_v34  ;;  %v4276_v31 = vpop.f32.mrb[18].mxu0 }
 0x1f3   : > { %v1813_v32 = vpop.f32.mrb[19].mxu1  ;;  %v4315_v42 = vadd.f32 %v4276_v31, %v4076_v36  ;;  %v2883_v43 = vpop.f32.mrb[19].mxu0 }
 0x1f4   : > { %v3100_v52 = vadd.f32 %v3099_v25, %v3069_v18  ;;  %v4316_v26 = vadd.f32 %v2883_v43, %v1813_v32  ;;  %v3032_v51 = vadd.f32 %v4313_v27, %v3031_v15 }
 0x1f5   : > { %3003 = vst [vmem:[%s5751_s20 + $0x98] sm:$0xff] %v4315_v42  ;;  %v3072_v22 = vmul.f32 %v4315_v42, %v4315_v42 }
 0x1f6   : > { %v4079_v46 = vpop.f32.mrb[20].mxu1  ;;  %3002 = vst [vmem:[%s5751_s20 + $0x90] sm:$0xff] %v4316_v26  ;;  %v3033_v9 = vadd.f32 %v4316_v26, %v3032_v51  ;;  %v3071_v6 = vmul.f32 %v4316_v26, %v4316_v26  ;;  %v3101_v58 = vadd.f32 %v3100_v52, %v3070_v50  ;;  %v4279_v59 = vpop.f32.mrb[20].mxu0 }
 0x1f7   : > { %v1823_v3 = vpop.f32.mrb[21].mxu1  ;;  %v4317_v7 = vadd.f32 %v4279_v59, %v4079_v46  ;;  %v2893_v8 = vpop.f32.mrb[21].mxu0 }
 0x1f8   : > { %v3102_v28 = vadd.f32 %v3101_v58, %v3071_v6  ;;  %v4318_v29 = vadd.f32 %v2893_v8, %v1823_v3  ;;  %v3034_v53 = vadd.f32 %v4315_v42, %v3033_v9 }
 0x1f9   : > { %3005 = vst [vmem:[%s5751_s20 + $0xa8] sm:$0xff] %v4317_v7  ;;  %v3074_v19 = vmul.f32 %v4317_v7, %v4317_v7 }
 0x1fa   : > { %v4082_v55 = vpop.f32.mrb[22].mxu1  ;;  %3004 = vst [vmem:[%s5751_s20 + $0xa0] sm:$0xff] %v4318_v29  ;;  %v3035_v21 = vadd.f32 %v4318_v29, %v3034_v53  ;;  %v3073_v24 = vmul.f32 %v4318_v29, %v4318_v29  ;;  %v3103_v10 = vadd.f32 %v3102_v28, %v3072_v22  ;;  %v4282_v12 = vpop.f32.mrb[22].mxu0 }
 0x1fb   : > { %v1833_v40 = vpop.f32.mrb[23].mxu1  ;;  %v4319_v20 = vadd.f32 %v4282_v12, %v4082_v55  ;;  %v2903_v54 = vpop.f32.mrb[23].mxu0 }
 0x1fc   : > { %v3104_v13 = vadd.f32 %v3103_v10, %v3073_v24  ;;  %v4320_v39 = vadd.f32 %v2903_v54, %v1833_v40  ;;  %v3036_v41 = vadd.f32 %v4317_v7, %v3035_v21 }
 0x1fd   : > { %3007 = vst [vmem:[%s5751_s20 + $0xb8] sm:$0xff] %v4319_v20  ;;  %v3076_v11 = vmul.f32 %v4319_v20, %v4319_v20 }
 0x1fe   : > { %v4085_v17 = vpop.f32.mrb[24].mxu1  ;;  %3006 = vst [vmem:[%s5751_s20 + $0xb0] sm:$0xff] %v4320_v39  ;;  %v3037_v61 = vadd.f32 %v4320_v39, %v3036_v41  ;;  %v3075_v45 = vmul.f32 %v4320_v39, %v4320_v39  ;;  %v3105_v0 = vadd.f32 %v3104_v13, %v3074_v19  ;;  %v4285_v33 = vpop.f32.mrb[24].mxu0 }
 0x1ff   : > { %v1843_v48 = vpop.f32.mrb[25].mxu1  ;;  %v4321_v16 = vadd.f32 %v4285_v33, %v4085_v17  ;;  %v2913_v5 = vpop.f32.mrb[25].mxu0 }
 0x200   : > { %v3106_v47 = vadd.f32 %v3105_v0, %v3075_v45  ;;  %v4322_v63 = vadd.f32 %v2913_v5, %v1843_v48  ;;  %v3038_v23 = vadd.f32 %v4319_v20, %v3037_v61  ;;  %v3122_v20 = vlaneseq }
 0x201   : > { %3009 = vst [vmem:[%s5751_s20 + $0xc8] sm:$0xff] %v4321_v16  ;;  %v3078_v35 = vmul.f32 %v4321_v16, %v4321_v16 }
 0x202   : > { %v4088_v57 = vpop.f32.mrb[26].mxu1  ;;  %3008 = vst [vmem:[%s5751_s20 + $0xc0] sm:$0xff] %v4322_v63  ;;  %v3039_v30 = vadd.f32 %v4322_v63, %v3038_v23  ;;  %v3077_v49 = vmul.f32 %v4322_v63, %v4322_v63  ;;  %v3107_v38 = vadd.f32 %v3106_v47, %v3076_v11  ;;  %v4288_v56 = vpop.f32.mrb[26].mxu0  ;;  %v3123_v41 = vshrl.u32 %v3122_v20, 7 }
 0x203   : > { %v1853_v37 = vpop.f32.mrb[27].mxu1  ;;  %v4323_v62 = vadd.f32 %v4288_v56, %v4088_v57  ;;  %v2923_v4 = vpop.f32.mrb[27].mxu0 }
 0x204   : > { %v3108_v44 = vadd.f32 %v3107_v38, %v3077_v49  ;;  %v4324_v27 = vadd.f32 %v2923_v4, %v1853_v37  ;;  %v3040_v2 = vadd.f32 %v4321_v16, %v3039_v30  ;;  %vm3124_vm3 = vcmp.eq.s32.totalorder %v3123_v41, 0 }
 0x205   : > { %3011 = vst [vmem:[%s5751_s20 + $0xd8] sm:$0xff] %v4323_v62  ;;  %v3080_v31 = vmul.f32 %v4323_v62, %v4323_v62  ;;  %vm3126_vm4 = vcmp.eq.s32.totalorder %v3123_v41, 1 }
 0x206   : > { %v4091_v34 = vpop.f32.mrb[28].mxu1  ;;  %3010 = vst [vmem:[%s5751_s20 + $0xd0] sm:$0xff] %v4324_v27  ;;  %v3041_v14 = vadd.f32 %v4324_v27, %v3040_v2  ;;  %v3079_v60 = vmul.f32 %v4324_v27, %v4324_v27  ;;  %v3109_v1 = vadd.f32 %v3108_v44, %v3078_v35  ;;  %v4291_v36 = vpop.f32.mrb[28].mxu0 }
 0x207   : > { %v1863_v15 = vpop.f32.mrb[29].mxu1  ;;  %v4325_v18 = vadd.f32 %v4291_v36, %v4091_v34  ;;  %v2933_v25 = vpop.f32.mrb[29].mxu0 }
 0x208   : > { %v3110_v32 = vadd.f32 %v3109_v1, %v3079_v60  ;;  %v4326_v42 = vadd.f32 %v2933_v25, %v1863_v15  ;;  %v3042_v43 = vadd.f32 %v4323_v62, %v3041_v14 }
 0x209   : > { %3013 = vst [vmem:[%s5751_s20 + $0xe8] sm:$0xff] %v4325_v18  ;;  %v3082_v59 = vmul.f32 %v4325_v18, %v4325_v18 }
 0x20a   : > { %v4094_v50 = vpop.f32.mrb[30].mxu1  ;;  %3012 = vst [vmem:[%s5751_s20 + $0xe0] sm:$0xff] %v4326_v42  ;;  %v3043_v52 = vadd.f32 %v4326_v42, %v3042_v43  ;;  %v3081_v26 = vmul.f32 %v4326_v42, %v4326_v42  ;;  %v3111_v51 = vadd.f32 %v3110_v32, %v3080_v31  ;;  %v4294_v46 = vpop.f32.mrb[30].mxu0 }
 0x20b   : > { %v1873_v9 = vpop.f32.mrb[31].mxu1  ;;  %v4327_v6 = vadd.f32 %v4294_v46, %v4094_v50  ;;  %v2943_v58 = vpop.f32.mrb[31].mxu0 }
 0x20c   : > { %v3112_v3 = vadd.f32 %v3111_v51, %v3081_v26  ;;  %v4328_v7 = vadd.f32 %v2943_v58, %v1873_v9  ;;  %v3044_v8 = vadd.f32 %v4325_v18, %v3043_v52 }
 0x20d   : > { %3015 = vst [vmem:[%s5751_s20 + $0xf8] sm:$0xff] %v4327_v6  ;;  %v3084_v53 = vmul.f32 %v4327_v6, %v4327_v6 }
 0x20e   : > { %3014 = vst [vmem:[%s5751_s20 + $0xf0] sm:$0xff] %v4328_v7  ;;  %v3045_v22 = vadd.f32 %v4328_v7, %v3044_v8  ;;  %v3083_v28 = vmul.f32 %v4328_v7, %v4328_v7  ;;  %v3113_v29 = vadd.f32 %v3112_v3, %v3082_v59 }
 0x210   : > { %v3046_v55 = vadd.f32 %v4327_v6, %v3045_v22  ;;  %v3114_v21 = vadd.f32 %v3113_v29, %v3083_v28 }
 0x212   : > { %v3047_v24 = vrot.slane %v3046_v55, 4  ;;  %v3115_v10 = vadd.f32 %v3114_v21, %v3084_v53 }
 0x214   : > { %v3048_v12 = vadd.f32 %v3047_v24, %v3046_v55  ;;  %v3116_v40 = vrot.slane %v3115_v10, 4 }
 0x216   : > { %v3049_v54 = vrot.slane %v3048_v12, 2  ;;  %v3117_v19 = vadd.f32 %v3116_v40, %v3115_v10 }
 0x218   : > { %v3050_v13 = vadd.f32 %v3049_v54, %v3048_v12  ;;  %v3118_v39 = vrot.slane %v3117_v19, 2 }
 0x21a   : > { %v3051_v17 = vrot.slane %v3050_v13, 1  ;;  %v3119_v61 = vadd.f32 %v3118_v39, %v3117_v19 }
 0x21c   : > { %v3052_v45 = vadd.f32 %v3051_v17, %v3050_v13  ;;  %v3120_v0 = vrot.slane %v3119_v61, 1 }
 0x21e   : > { %v3121_v33 = vadd.f32 %v3120_v0, %v3119_v61  ;;  %v3125_v48 = vsel %vm3124_vm3, %v3052_v45, 0.0 }
 0x220   : > { %v3127_v16 = vsel %vm3126_vm4, %v3121_v33, 0.0 }
 0x221   : > { %v3128_v5 = vadd.f32 %v3127_v16, %v3125_v48 }
 0x223   : > { %3129 = vst [vmem:[%s207_s23] sm:$0xff] %v3128_v5 }
 0x224 PF: > { %s14_s14 = sadd.s32 1, %s4600_s14   ;;  %s5982_s12 = smov %s4596_s13 }
 0x225   : > { %p11_p6 = scmp.ge.s32.totalorder %s14_s14, 4   ;;  %s5983_s13 = smov %s5985_s15 }
 0x227   :  { %13 = sbr.rel (!%p11_p6) target bundleno = 2 (0x2), region = 79 }

</bundles_post_ra>
